<compile_context>
chip_gen: v7x
topology: tpu7x:2x2x1
jax: 0.10.0
libtpu: 0.0.40
codegen_flags: <defaults>
</compile_context>

<pallas_src>
import functools

import jax
import jax.numpy as jnp
from jax import lax
from jax.experimental import pallas as pl
from jax.experimental.pallas import tpu as pltpu

ELMO_DIM, GLOVE_DIM, ONEHOT_DIM = 1024, 300, 7
LANE = 128
BATCH_PAD = 16          # sublane padding for the batch dim (bf16-native 16 rows)


def _round_up(x, m):
    return ((x + m - 1) // m) * m


def _choose_tb(T, Np, Hp, threeHp, out_per_t_bytes, cap=128, budget=24 << 20):
    """Largest time-block that keeps double-buffered blocks within `budget`."""
    fixed = (2 * (Hp * threeHp * 2 + Hp * 4 + Np * LANE * 4)   # whh + bhn + lens
             + Np * Hp * 4 + (2 << 20))                        # h scratch + headroom
    per_t = 2 * (Np * threeHp * 2 + out_per_t_bytes)           # gx + out (double-buffered)
    tb_max = max(1, min(cap, (budget - fixed) // max(per_t, 1)))
    return int(min(T, tb_max))


# ----------------------------------------------------------------------------
# Pallas kernel: GRU recurrence.  Grid = (n_dirs, n_time_blocks).
#   * direction axis "parallel" (independent -> megacore on v7x)
#   * time axis "arbitrary" (sequential recurrence, h carried in VMEM scratch)
# For time_reverse=True, direction d==1 reads/writes time-reversed blocks via
# the index_map and a reversed in-block index, so no flipped copy of gx exists.
# ----------------------------------------------------------------------------
def _gru_kernel(*refs, hp, tb, use_mask, return_seq, time_reverse, t_valid, unroll):
    if use_mask:
        gx_ref, whh_ref, bhn_ref, lens_ref, out_ref, h_ref = refs
    else:
        gx_ref, whh_ref, bhn_ref, out_ref, h_ref = refs
        lens_ref = None

    blk = pl.program_id(1)                      # time-block index (processed order)
    n_blk = pl.num_programs(1)

    @pl.when(blk == 0)
    def _():
        h_ref[...] = jnp.zeros(h_ref.shape, h_ref.dtype)

    # ---- loop-invariant loads hoisted off the serial h->h critical path ----
    whh = whh_ref[...]                          # (Hp, 3Hp) bf16, MXU RHS
    bhn = bhn_ref[...]                          # (1, Hp) f32 (hidden bias of n-gate)
    lens_col = (jnp.max(lens_ref[...], axis=1, keepdims=True)
                if use_mask else None)          # (Np, 1) int32
    rev = pl.program_id(0) if time_reverse else None   # 1 -> reversed direction

    def step(i, carry):
        if time_reverse:
            i_orig = i + rev * (tb - 1 - 2 * i)          # in-block time reversal
        else:
            i_orig = i
        h = h_ref[...]                                   # (Np, Hp) f32
        # recurrent matmul on the MXU: bf16 operands, f32 accumulation
        gh = jnp.dot(h.astype(jnp.bfloat16), whh,
                     preferred_element_type=jnp.float32)          # (Np, 3Hp)
        gx = gx_ref[i_orig].astype(jnp.float32)                    # (Np, 3Hp) bf16->f32
        # PyTorch gate order [r | z | n]; b_ih(+b_hh_{r,z}) already folded into gx.
        r = jax.nn.sigmoid(gx[:, 0 * hp:1 * hp] + gh[:, 0 * hp:1 * hp])
        z = jax.nn.sigmoid(gx[:, 1 * hp:2 * hp] + gh[:, 1 * hp:2 * hp])
        n = jnp.tanh(gx[:, 2 * hp:3 * hp] + r * (gh[:, 2 * hp:3 * hp] + bhn))
        h_new = (1.0 - z) * n + z * h
        if use_mask or (t_valid is not None):
            if time_reverse:
                tblk = blk + rev * (n_blk - 1 - 2 * blk)
            else:
                tblk = blk
            t = tblk * tb + i_orig                       # original global time index
            if use_mask:
                h_new = jnp.where(lens_col > t, h_new, h)    # packed-sequence freeze
            else:
                h_new = jnp.where(t < t_valid, h_new, h)     # padded-T freeze
        h_ref[...] = h_new
        if return_seq:
            out_ref[i_orig] = h_new.astype(out_ref.dtype)
        return carry

    lax.fori_loop(0, tb, step, 0, unroll=unroll)

    if not return_seq:
        @pl.when(blk == n_blk - 1)
        def _():
            out_ref[...] = h_ref[...].astype(out_ref.dtype)      # final hidden only


# ----------------------------------------------------------------------------
# projection (plain XLA, one big bf16 MXU matmul for all directions) + Pallas
# recurrence driver.
# ----------------------------------------------------------------------------
def _run_gru(x_pad, wihT, bih, whh, bhn, lens_bc, *, return_seq, time_reverse):
    """x_pad: (T, Np, D) f32.  wihT: (D, n_dirs*3Hp).  bih: (n_dirs*3Hp,).
    whh: (n_dirs, Hp, 3Hp) bf16.  bhn: (n_dirs, 1, Hp) f32.
    lens_bc: (Np, 128) int32 or None.
    Returns (n_dirs, Tp, Np, Hp) bf16 if return_seq else (n_dirs, Np, Hp) f32."""
    T, Np, D = x_pad.shape
    n_dirs, Hp, threeHp = whh.shape
    use_mask = lens_bc is not None

    # Hoisted, time-parallel input projection for ALL directions at once; the
    # resulting gate slab is stored in bf16 (dominant HBM<->VMEM stream).
    gx = jnp.dot(x_pad.reshape(T * Np, D).astype(jnp.bfloat16),
                 wihT.astype(jnp.bfloat16),
                 preferred_element_type=jnp.float32) + bih[None, :]
    gx = gx.reshape(T, Np, n_dirs * threeHp).astype(jnp.bfloat16)

    out_per_t = Np * Hp * 2 if return_seq else 0
    tb = _choose_tb(T, Np, Hp, threeHp, out_per_t)
    Tp = _round_up(T, tb)
    if Tp != T:
        gx = jnp.pad(gx, ((0, Tp - T), (0, 0), (0, 0)))
    n_blk = Tp // tb
    t_valid = T if Tp != T else None

    if time_reverse:
        tmap = lambda d, b: b + d * (n_blk - 1 - 2 * b)   # d==1: reversed time blocks
    else:
        tmap = lambda d, b: b

    in_specs = [
        pl.BlockSpec((tb, Np, threeHp), lambda d, b: (tmap(d, b), 0, d)),   # gx slab
        pl.BlockSpec((None, Hp, threeHp), lambda d, b: (d, 0, 0)),          # W_hh^T
        pl.BlockSpec((None, 1, Hp), lambda d, b: (d, 0, 0)),                # b_hn
    ]
    args = [gx, whh, bhn]
    if use_mask:
        in_specs.append(pl.BlockSpec((Np, LANE), lambda d, b: (0, 0)))      # lens
        args.append(lens_bc)

    if return_seq:
        out_spec = pl.BlockSpec((None, tb, Np, Hp),
                                lambda d, b: (d, tmap(d, b), 0, 0))
        out_shape = jax.ShapeDtypeStruct((n_dirs, Tp, Np, Hp), jnp.bfloat16)
    else:
        out_spec = pl.BlockSpec((None, Np, Hp), lambda d, b: (d, 0, 0))
        out_shape = jax.ShapeDtypeStruct((n_dirs, Np, Hp), jnp.float32)

    # explicit VMEM budget (double-buffered blocks + resident h + headroom),
    # capped at 32 MiB so it also fits v7x's 64 MiB per-TC VMEM.
    fixed = (2 * (Hp * threeHp * 2 + Hp * 4 + (Np * LANE * 4 if use_mask else 0))
             + Np * Hp * 4 + (2 << 20))
    per_t = 2 * (Np * threeHp * 2 + out_per_t)
    vmem_limit = int(min(max(fixed + per_t * tb + Np * Hp * 4, 8 << 20), 32 << 20))

    kernel = functools.partial(
        _gru_kernel, hp=Hp, tb=tb, use_mask=use_mask, return_seq=return_seq,
        time_reverse=time_reverse, t_valid=t_valid,
        unroll=True if tb <= 32 else 4)

    return pl.pallas_call(
        kernel,
        out_shape=out_shape,
        grid_spec=pltpu.PrefetchScalarGridSpec(
            num_scalar_prefetch=0,
            grid=(n_dirs, n_blk),
            in_specs=in_specs,
            out_specs=out_spec,
            scratch_shapes=[pltpu.VMEM((Np, Hp), jnp.float32)],
        ),
        compiler_params=pltpu.CompilerParams(
            dimension_semantics=("parallel", "arbitrary"),
            vmem_limit_bytes=vmem_limit),
    )(*args)


# ----------------------------------------------------------------------------
# weight padding (PyTorch [r|z|n] layout -> 128-aligned gate blocks) + bias fold
# ----------------------------------------------------------------------------
def _pad_gru_dir(w_ih, w_hh, b_ih, b_hh, Hp):
    """Each gate gets its own 128-aligned Hp-wide column block.  The r/z parts
    of b_hh are folded into the projection bias (they add linearly inside the
    sigmoids); only b_hn remains separate (it sits inside r*(...))."""
    w_ih = jnp.asarray(w_ih, jnp.float32)
    w_hh = jnp.asarray(w_hh, jnp.float32)
    b_ih = jnp.asarray(b_ih, jnp.float32)
    b_hh = jnp.asarray(b_hh, jnp.float32)
    H = w_hh.shape[1]
    D = w_ih.shape[1]
    wihT = jnp.zeros((D, 3 * Hp), jnp.float32)
    whhT = jnp.zeros((Hp, 3 * Hp), jnp.float32)
    bih = jnp.zeros((3 * Hp,), jnp.float32)
    bhn = jnp.zeros((Hp,), jnp.float32)
    for g in range(3):
        wihT = wihT.at[:, g * Hp:g * Hp + H].set(w_ih[g * H:(g + 1) * H, :].T)
        whhT = whhT.at[:H, g * Hp:g * Hp + H].set(w_hh[g * H:(g + 1) * H, :].T)
        bg = b_ih[g * H:(g + 1) * H]
        if g < 2:                                   # r, z gates: fold hidden bias
            bg = bg + b_hh[g * H:(g + 1) * H]
        bih = bih.at[g * Hp:g * Hp + H].set(bg)
    bhn = bhn.at[:H].set(b_hh[2 * H:3 * H])
    return wihT, whhT, bih, bhn


def _pad_batch(x, Np):
    T, N, _ = x.shape
    if Np == N:
        return x
    return jnp.pad(x, ((0, 0), (0, Np - N), (0, 0)))


# ----------------------------------------------------------------------------
# GRU wrappers
# ----------------------------------------------------------------------------
def gru_forward_final(x, lens, w_ih, w_hh, b_ih, b_hh):
    """Forward-direction GRU over a (T, N, D) padded batch; returns the final
    hidden state at t = len-1 per sequence (pack_padded_sequence semantics)."""
    T, N, _ = x.shape
    H = w_hh.shape[1]
    Hp = _round_up(H, LANE)
    Np = _round_up(N, BATCH_PAD)
    wihT, whhT, bih, bhn = _pad_gru_dir(w_ih, w_hh, b_ih, b_hh, Hp)
    x_pad = _pad_batch(x.astype(jnp.float32), Np)
    lens_pad = jnp.zeros((Np,), jnp.int32).at[:N].set(jnp.asarray(lens, jnp.int32))
    lens_bc = jnp.broadcast_to(lens_pad[:, None], (Np, LANE))    # (Np, 128) mask operand
    h_fin = _run_gru(x_pad, wihT, bih,
                     whhT[None].astype(jnp.bfloat16), bhn[None, None, :],
                     lens_bc, return_seq=False, time_reverse=False)
    return h_fin[0, :N, :H]                                      # (N, H) f32


def bigru_layer(x, w_ih_f, w_hh_f, b_ih_f, b_hh_f,
                w_ih_b, w_hh_b, b_ih_b, b_hh_b):
    """One bidirectional GRU layer over full-length (unpacked) sequences.
    Both directions fused into one pallas_call; the backward direction is
    time-reversed inside the kernel (index_map + in-block index), which is
    exact here because the word RNN sees full-length sequences."""
    T, N, _ = x.shape
    H = w_hh_f.shape[1]
    Hp = _round_up(H, LANE)
    Np = _round_up(N, BATCH_PAD)
    x_pad = _pad_batch(x.astype(jnp.float32), Np)

    wihT_f, whhT_f, bih_f, bhn_f = _pad_gru_dir(w_ih_f, w_hh_f, b_ih_f, b_hh_f, Hp)
    wihT_b, whhT_b, bih_b, bhn_b = _pad_gru_dir(w_ih_b, w_hh_b, b_ih_b, b_hh_b, Hp)

    # fused [fwd | bwd] projection: one (T*Np, D) x (D, 6Hp) MXU matmul, and NO
    # time-flip / stack copies of gx.
    wihT = jnp.concatenate([wihT_f, wihT_b], axis=1)             # (D, 6Hp)
    bih = jnp.concatenate([bih_f, bih_b], axis=0)                # (6Hp,)
    whh = jnp.stack([whhT_f, whhT_b], axis=0).astype(jnp.bfloat16)
    bhn = jnp.stack([bhn_f, bhn_b], axis=0)[:, None, :]          # (2, 1, Hp)

    out = _run_gru(x_pad, wihT, bih, whh, bhn, None,
                   return_seq=True, time_reverse=True)           # (2, Tp, Np, Hp) bf16
    h_f = out[0, :T, :N, :H].astype(jnp.float32)
    h_b = out[1, :T, :N, :H].astype(jnp.float32)                 # already un-flipped
    return jnp.concatenate([h_f, h_b], axis=-1)                  # (T, N, 2H) f32


# ----------------------------------------------------------------------------
# SharedRNN forward (glue in plain JAX, recurrent hot path in Pallas)
# ----------------------------------------------------------------------------
def shared_rnn_forward(params, char_encoded, char_lengths, elmo, glove, onehot,
                       *, num_layers):
    B, Tw, _ = elmo.shape

    # ---- CharRNN: embedding lookup (XLA gather) + forward GRU over characters.
    # `_, (final_h, _) = gru(packed)` unpacks h_n[0] == the FORWARD direction's
    # final hidden state, so only the forward recurrence is needed.
    char_x = params["cemb"][char_encoded]                        # (W, Lc, C)
    char_x = jnp.transpose(char_x, (1, 0, 2))                    # time-major (Lc, W, C)
    char_final = gru_forward_final(char_x, char_lengths,
                                   params["char_w_ih"], params["char_w_hh"],
                                   params["char_b_ih"], params["char_b_hh"])
    char_emb = char_final.reshape(B, Tw, -1)                     # view(B, W//B, C)

    # ---- concat [elmo | glove | char | onehot] along feature dim ----
    feats = jnp.concatenate(
        [elmo.astype(jnp.float32), glove.astype(jnp.float32),
         char_emb, onehot.astype(jnp.float32)], axis=2)          # (B, Tw, word_dim)

    # TODO(synk): training-mode dropout RNG not reproduced (inference/eval identity).

    # ---- wordRNN: bidirectional GRU; time axis = dim0 (=B), batch = dim1 (=Tw),
    # exactly as PyTorch feeds (B, Tw, word_dim) into nn.GRU without batch_first.
    x = feats
    for l in range(num_layers):
        x = bigru_layer(x,
                        params[f"w_ih_l{l}"], params[f"w_hh_l{l}"],
                        params[f"b_ih_l{l}"], params[f"b_hh_l{l}"],
                        params[f"w_ih_l{l}_rev"], params[f"w_hh_l{l}_rev"],
                        params[f"b_ih_l{l}_rev"], params[f"b_hh_l{l}_rev"])
    return x


# ----------------------------------------------------------------------------
# deterministic parameter init (PyTorch-style uniform(-1/sqrt(H), 1/sqrt(H)))
# ----------------------------------------------------------------------------
def init_params(key, *, num_char_types, char_dim, shared_layer_size, num_layers):
    params = {}
    keys = iter(jax.random.split(key, 128))

    def unif(shape, bound):
        return jax.random.uniform(next(keys), shape, jnp.float32, -bound, bound)

    # char embedding (padding_idx=0 -> zero row)
    cemb = jax.random.normal(next(keys), (num_char_types, char_dim), jnp.float32)
    params["cemb"] = cemb.at[0].set(0.0)

    # char GRU (input=char_dim, hidden=char_dim), forward direction weights
    bc = 1.0 / (char_dim ** 0.5)
    params["char_w_ih"] = unif((3 * char_dim, char_dim), bc)
    params["char_w_hh"] = unif((3 * char_dim, char_dim), bc)
    params["char_b_ih"] = unif((3 * char_dim,), bc)
    params["char_b_hh"] = unif((3 * char_dim,), bc)

    # word GRU
    H = shared_layer_size
    word_dim = ELMO_DIM + GLOVE_DIM + char_dim + ONEHOT_DIM
    bw = 1.0 / (H ** 0.5)
    for l in range(num_layers):
        in_dim = word_dim if l == 0 else 2 * H
        for suf in ("", "_rev"):
            params[f"w_ih_l{l}{suf}"] = unif((3 * H, in_dim), bw)
            params[f"w_hh_l{l}{suf}"] = unif((3 * H, H), bw)
            params[f"b_ih_l{l}{suf}"] = unif((3 * H,), bw)
            params[f"b_hh_l{l}{suf}"] = unif((3 * H,), bw)
    return params


if __name__ == "__main__":
    # small, module-consistent shapes
    B, Tw = 2, 8                      # sentences, words per sentence
    W = B * Tw                        # total words in batch
    Lc = 8                            # max chars per word
    num_char_types = 30
    char_dim = 16
    shared_layer_size = 32
    num_layers = 1

    key = jax.random.PRNGKey(0)
    k0, k1, k2, k3, k4, k5 = jax.random.split(key, 6)

    params = init_params(k0, num_char_types=num_char_types, char_dim=char_dim,
                         shared_layer_size=shared_layer_size, num_layers=num_layers)

    char_lengths = jax.random.randint(k1, (W,), 1, Lc + 1).astype(jnp.int32)
    char_ids = jax.random.randint(k2, (W, Lc), 1, num_char_types).astype(jnp.int32)
    pos = jnp.arange(Lc)[None, :]
    char_encoded = jnp.where(pos < char_lengths[:, None], char_ids, 0)   # pad with 0

    elmo = jax.random.normal(k3, (B, Tw, ELMO_DIM), jnp.float32)
    glove = jax.random.normal(k4, (B, Tw, GLOVE_DIM), jnp.float32)
    onehot = (jax.random.randint(k5, (B, Tw, ONEHOT_DIM), 0, 2)).astype(jnp.float32)

    fwd = jax.jit(functools.partial(shared_rnn_forward, num_layers=num_layers))
    out = fwd(params, char_encoded, char_lengths, elmo, glove, onehot)
    out = jax.block_until_ready(out)

    assert out.shape == (B, Tw, 2 * shared_layer_size), out.shape
    assert bool(jnp.all(jnp.isfinite(out)))
    print("KERNEL_OK")
</pallas_src>

<mosaic_0001>
module attributes {stable_mosaic.version = 11 : i64} {
  func.func @_gru_kernel(%arg0: i32, %arg1: i32, %arg2: memref<8x16x384xbf16, #tpu.memory_space<vmem>>, %arg3: memref<1x128x384xbf16, #tpu.memory_space<vmem>>, %arg4: memref<1x1x128xf32, #tpu.memory_space<vmem>>, %arg5: memref<16x128xi32, #tpu.memory_space<vmem>>, %arg6: memref<1x16x128xf32, #tpu.memory_space<vmem>>, %arg7: memref<16x128xf32, #tpu.memory_space<vmem>>) attributes {dimension_semantics = [#tpu.dimension_semantics<parallel>, #tpu.dimension_semantics<arbitrary>], iteration_bounds = array<i64: 1, 1>, scalar_prefetch = 0 : i64, scratch_operands = 1 : i64, tpu.core_type = #tpu.core_type<tc>, window_params = [{transform_indices = @transform_0, window_bounds = array<i64: 8, 16, 384>}, {transform_indices = @transform_1, window_bounds = array<i64: 1, 128, 384>}, {transform_indices = @transform_2, window_bounds = array<i64: 1, 1, 128>}, {pipeline_mode = #tpu.pipeline_mode<synchronous>, transform_indices = @transform_3, window_bounds = array<i64: 16, 128>}, {transform_indices = @transform_4, window_bounds = array<i64: 1, 16, 128>}]} {
    %c0_i32 = arith.constant 0 : i32
    %0 = arith.cmpi eq, %arg1, %c0_i32 : i32
    %1 = arith.extui %0 : i1 to i32
    %c0_i32_0 = arith.constant 0 : i32
    %2 = arith.cmpi ne, %1, %c0_i32_0 : i32
    scf.if %2 {
      %cst_99 = arith.constant 0.000000e+00 : f32
      %357 = vector.broadcast %cst_99 : f32 to vector<16x128xf32>
      %c0_100 = arith.constant 0 : index
      %c0_101 = arith.constant 0 : index
      %358 = vector.load %arg7[%c0_100, %c0_101] : memref<16x128xf32, #tpu.memory_space<vmem>>, vector<16x128xf32>
      tpu.vector_store %arg7[%c0_100, %c0_101], %357 {strides = array<i32>} : memref<16x128xf32, #tpu.memory_space<vmem>>, vector<16x128xf32>,
    } else {
    }
    %c0 = arith.constant 0 : index
    %c0_1 = arith.constant 0 : index
    %c0_2 = arith.constant 0 : index
    %3 = vector.load %arg3[%c0, %c0_1, %c0_2] : memref<1x128x384xbf16, #tpu.memory_space<vmem>>, vector<1x128x384xbf16>
    %4 = vector.shape_cast %3 : vector<1x128x384xbf16> to vector<128x384xbf16>
    %c0_3 = arith.constant 0 : index
    %c0_4 = arith.constant 0 : index
    %c0_5 = arith.constant 0 : index
    %5 = vector.load %arg4[%c0_3, %c0_4, %c0_5] : memref<1x1x128xf32, #tpu.memory_space<vmem>>, vector<1x1x128xf32>
    %6 = vector.shape_cast %5 : vector<1x1x128xf32> to vector<1x128xf32>
    %c0_6 = arith.constant 0 : index
    %c0_7 = arith.constant 0 : index
    %7 = vector.load %arg5[%c0_6, %c0_7] : memref<16x128xi32, #tpu.memory_space<vmem>>, vector<16x128xi32>
    %cst = arith.constant dense<-2147483648> : vector<16xi32>
    %8 = vector.multi_reduction <maxsi>, %7, %cst [1] : vector<16x128xi32> to vector<16xi32>
    %9 = vector.shape_cast %8 : vector<16xi32> to vector<16x1xi32>
    %c0_i32_8 = arith.constant 0 : i32
    %c0_9 = arith.constant 0 : index
    %c0_10 = arith.constant 0 : index
    %10 = vector.load %arg7[%c0_9, %c0_10] : memref<16x128xf32, #tpu.memory_space<vmem>>, vector<16x128xf32>
    %11 = arith.truncf %10 : vector<16x128xf32> to vector<16x128xbf16>
    %cst_11 = arith.constant dense<0.000000e+00> : vector<16x384xf32>
    %12 = tpu.matmul %11, %4, %cst_11 {dimension_numbers = #tpu.dot_dimension_numbers<[1], [0], [0], [1], [0, 0, 1, 1], [], []>} : vector<16x128xbf16>, vector<128x384xbf16>, vector<16x384xf32> -> vector<16x384xf32>
    %13 = arith.index_cast %c0_i32_8 : i32 to index
    %c0_12 = arith.constant 0 : index
    %c0_13 = arith.constant 0 : index
    %14 = vector.load %arg2[%13, %c0_12, %c0_13] : memref<8x16x384xbf16, #tpu.memory_space<vmem>>, vector<1x16x384xbf16>
    %15 = vector.shape_cast %14 : vector<1x16x384xbf16> to vector<16x384xbf16>
    %16 = arith.extf %15 : vector<16x384xbf16> to vector<16x384xf32>
    %17 = vector.extract_strided_slice %16 {offsets = [0, 0], sizes = [16, 128], strides = [1, 1]} : vector<16x384xf32> to vector<16x128xf32>
    %18 = vector.extract_strided_slice %12 {offsets = [0, 0], sizes = [16, 128], strides = [1, 1]} : vector<16x384xf32> to vector<16x128xf32>
    %19 = arith.addf %17, %18 : vector<16x128xf32>
    %20 = arith.negf %19 : vector<16x128xf32>
    %21 = math.exp %20 : vector<16x128xf32>
    %cst_14 = arith.constant 1.000000e+00 : f32
    %22 = vector.broadcast %cst_14 : f32 to vector<16x128xf32>
    %23 = arith.addf %22, %21 : vector<16x128xf32>
    %24 = arith.divf %22, %23 : vector<16x128xf32>
    %25 = vector.extract_strided_slice %16 {offsets = [0, 128], sizes = [16, 128], strides = [1, 1]} : vector<16x384xf32> to vector<16x128xf32>
    %26 = vector.extract_strided_slice %12 {offsets = [0, 128], sizes = [16, 128], strides = [1, 1]} : vector<16x384xf32> to vector<16x128xf32>
    %27 = arith.addf %25, %26 : vector<16x128xf32>
    %28 = arith.negf %27 : vector<16x128xf32>
    %29 = math.exp %28 : vector<16x128xf32>
    %cst_15 = arith.constant 1.000000e+00 : f32
    %30 = vector.broadcast %cst_15 : f32 to vector<16x128xf32>
    %31 = arith.addf %30, %29 : vector<16x128xf32>
    %32 = arith.divf %30, %31 : vector<16x128xf32>
    %33 = vector.extract_strided_slice %16 {offsets = [0, 256], sizes = [16, 128], strides = [1, 1]} : vector<16x384xf32> to vector<16x128xf32>
    %34 = vector.extract_strided_slice %12 {offsets = [0, 256], sizes = [16, 128], strides = [1, 1]} : vector<16x384xf32> to vector<16x128xf32>
    %35 = vector.broadcast %6 : vector<1x128xf32> to vector<16x128xf32>
    %36 = arith.addf %34, %35 : vector<16x128xf32>
    %37 = arith.mulf %24, %36 : vector<16x128xf32>
    %38 = arith.addf %33, %37 : vector<16x128xf32>
    %39 = math.tanh %38 : vector<16x128xf32>
    %cst_16 = arith.constant 1.000000e+00 : f32
    %40 = vector.broadcast %cst_16 : f32 to vector<16x128xf32>
    %41 = arith.subf %40, %32 : vector<16x128xf32>
    %42 = arith.mulf %41, %39 : vector<16x128xf32>
    %43 = arith.mulf %32, %10 : vector<16x128xf32>
    %44 = arith.addf %42, %43 : vector<16x128xf32>
    %c8_i32 = arith.constant 8 : i32
    %45 = arith.muli %arg1, %c8_i32 : i32
    %46 = arith.addi %45, %c0_i32_8 : i32
    %47 = vector.broadcast %46 : i32 to vector<16x1xi32>
    %48 = arith.cmpi sgt, %9, %47 : vector<16x1xi32>
    %49 = vector.shape_cast %48 : vector<16x1xi1> to vector<16x1xi1>
    %50 = vector.broadcast %49 : vector<16x1xi1> to vector<16x128xi1>
    %51 = arith.select %50, %44, %10 : vector<16x128xi1>, vector<16x128xf32>
    %c0_17 = arith.constant 0 : index
    %c0_18 = arith.constant 0 : index
    %52 = vector.load %arg7[%c0_17, %c0_18] : memref<16x128xf32, #tpu.memory_space<vmem>>, vector<16x128xf32>
    tpu.vector_store %arg7[%c0_17, %c0_18], %51 {strides = array<i32>} : memref<16x128xf32, #tpu.memory_space<vmem>>, vector<16x128xf32>,
    %c1_i32 = arith.constant 1 : i32
    %c0_19 = arith.constant 0 : index
    %c0_20 = arith.constant 0 : index
    %53 = vector.load %arg7[%c0_19, %c0_20] : memref<16x128xf32, #tpu.memory_space<vmem>>, vector<16x128xf32>
    %54 = arith.truncf %53 : vector<16x128xf32> to vector<16x128xbf16>
    %cst_21 = arith.constant dense<0.000000e+00> : vector<16x384xf32>
    %55 = tpu.matmul %54, %4, %cst_21 {dimension_numbers = #tpu.dot_dimension_numbers<[1], [0], [0], [1], [0, 0, 1, 1], [], []>} : vector<16x128xbf16>, vector<128x384xbf16>, vector<16x384xf32> -> vector<16x384xf32>
    %56 = arith.index_cast %c1_i32 : i32 to index
    %c0_22 = arith.constant 0 : index
    %c0_23 = arith.constant 0 : index
    %57 = vector.load %arg2[%56, %c0_22, %c0_23] : memref<8x16x384xbf16, #tpu.memory_space<vmem>>, vector<1x16x384xbf16>
    %58 = vector.shape_cast %57 : vector<1x16x384xbf16> to vector<16x384xbf16>
    %59 = arith.extf %58 : vector<16x384xbf16> to vector<16x384xf32>
    %60 = vector.extract_strided_slice %59 {offsets = [0, 0], sizes = [16, 128], strides = [1, 1]} : vector<16x384xf32> to vector<16x128xf32>
    %61 = vector.extract_strided_slice %55 {offsets = [0, 0], sizes = [16, 128], strides = [1, 1]} : vector<16x384xf32> to vector<16x128xf32>
    %62 = arith.addf %60, %61 : vector<16x128xf32>
    %63 = arith.negf %62 : vector<16x128xf32>
    %64 = math.exp %63 : vector<16x128xf32>
    %cst_24 = arith.constant 1.000000e+00 : f32
    %65 = vector.broadcast %cst_24 : f32 to vector<16x128xf32>
    %66 = arith.addf %65, %64 : vector<16x128xf32>
    %67 = arith.divf %65, %66 : vector<16x128xf32>
    %68 = vector.extract_strided_slice %59 {offsets = [0, 128], sizes = [16, 128], strides = [1, 1]} : vector<16x384xf32> to vector<16x128xf32>
    %69 = vector.extract_strided_slice %55 {offsets = [0, 128], sizes = [16, 128], strides = [1, 1]} : vector<16x384xf32> to vector<16x128xf32>
    %70 = arith.addf %68, %69 : vector<16x128xf32>
    %71 = arith.negf %70 : vector<16x128xf32>
    %72 = math.exp %71 : vector<16x128xf32>
    %cst_25 = arith.constant 1.000000e+00 : f32
    %73 = vector.broadcast %cst_25 : f32 to vector<16x128xf32>
    %74 = arith.addf %73, %72 : vector<16x128xf32>
    %75 = arith.divf %73, %74 : vector<16x128xf32>
    %76 = vector.extract_strided_slice %59 {offsets = [0, 256], sizes = [16, 128], strides = [1, 1]} : vector<16x384xf32> to vector<16x128xf32>
    %77 = vector.extract_strided_slice %55 {offsets = [0, 256], sizes = [16, 128], strides = [1, 1]} : vector<16x384xf32> to vector<16x128xf32>
    %78 = vector.broadcast %6 : vector<1x128xf32> to vector<16x128xf32>
    %79 = arith.addf %77, %78 : vector<16x128xf32>
    %80 = arith.mulf %67, %79 : vector<16x128xf32>
    %81 = arith.addf %76, %80 : vector<16x128xf32>
    %82 = math.tanh %81 : vector<16x128xf32>
    %cst_26 = arith.constant 1.000000e+00 : f32
    %83 = vector.broadcast %cst_26 : f32 to vector<16x128xf32>
    %84 = arith.subf %83, %75 : vector<16x128xf32>
    %85 = arith.mulf %84, %82 : vector<16x128xf32>
    %86 = arith.mulf %75, %53 : vector<16x128xf32>
    %87 = arith.addf %85, %86 : vector<16x128xf32>
    %c8_i32_27 = arith.constant 8 : i32
    %88 = arith.muli %arg1, %c8_i32_27 : i32
    %89 = arith.addi %88, %c1_i32 : i32
    %90 = vector.broadcast %89 : i32 to vector<16x1xi32>
    %91 = arith.cmpi sgt, %9, %90 : vector<16x1xi32>
    %92 = vector.shape_cast %91 : vector<16x1xi1> to vector<16x1xi1>
    %93 = vector.broadcast %92 : vector<16x1xi1> to vector<16x128xi1>
    %94 = arith.select %93, %87, %53 : vector<16x128xi1>, vector<16x128xf32>
    %c0_28 = arith.constant 0 : index
    %c0_29 = arith.constant 0 : index
    %95 = vector.load %arg7[%c0_28, %c0_29] : memref<16x128xf32, #tpu.memory_space<vmem>>, vector<16x128xf32>
    tpu.vector_store %arg7[%c0_28, %c0_29], %94 {strides = array<i32>} : memref<16x128xf32, #tpu.memory_space<vmem>>, vector<16x128xf32>,
    %c2_i32 = arith.constant 2 : i32
    %c0_30 = arith.constant 0 : index
    %c0_31 = arith.constant 0 : index
    %96 = vector.load %arg7[%c0_30, %c0_31] : memref<16x128xf32, #tpu.memory_space<vmem>>, vector<16x128xf32>
    %97 = arith.truncf %96 : vector<16x128xf32> to vector<16x128xbf16>
    %cst_32 = arith.constant dense<0.000000e+00> : vector<16x384xf32>
    %98 = tpu.matmul %97, %4, %cst_32 {dimension_numbers = #tpu.dot_dimension_numbers<[1], [0], [0], [1], [0, 0, 1, 1], [], []>} : vector<16x128xbf16>, vector<128x384xbf16>, vector<16x384xf32> -> vector<16x384xf32>
    %99 = arith.index_cast %c2_i32 : i32 to index
    %c0_33 = arith.constant 0 : index
    %c0_34 = arith.constant 0 : index
    %100 = vector.load %arg2[%99, %c0_33, %c0_34] : memref<8x16x384xbf16, #tpu.memory_space<vmem>>, vector<1x16x384xbf16>
    %101 = vector.shape_cast %100 : vector<1x16x384xbf16> to vector<16x384xbf16>
    %102 = arith.extf %101 : vector<16x384xbf16> to vector<16x384xf32>
    %103 = vector.extract_strided_slice %102 {offsets = [0, 0], sizes = [16, 128], strides = [1, 1]} : vector<16x384xf32> to vector<16x128xf32>
    %104 = vector.extract_strided_slice %98 {offsets = [0, 0], sizes = [16, 128], strides = [1, 1]} : vector<16x384xf32> to vector<16x128xf32>
    %105 = arith.addf %103, %104 : vector<16x128xf32>
    %106 = arith.negf %105 : vector<16x128xf32>
    %107 = math.exp %106 : vector<16x128xf32>
    %cst_35 = arith.constant 1.000000e+00 : f32
    %108 = vector.broadcast %cst_35 : f32 to vector<16x128xf32>
    %109 = arith.addf %108, %107 : vector<16x128xf32>
    %110 = arith.divf %108, %109 : vector<16x128xf32>
    %111 = vector.extract_strided_slice %102 {offsets = [0, 128], sizes = [16, 128], strides = [1, 1]} : vector<16x384xf32> to vector<16x128xf32>
    %112 = vector.extract_strided_slice %98 {offsets = [0, 128], sizes = [16, 128], strides = [1, 1]} : vector<16x384xf32> to vector<16x128xf32>
    %113 = arith.addf %111, %112 : vector<16x128xf32>
    %114 = arith.negf %113 : vector<16x128xf32>
    %115 = math.exp %114 : vector<16x128xf32>
    %cst_36 = arith.constant 1.000000e+00 : f32
    %116 = vector.broadcast %cst_36 : f32 to vector<16x128xf32>
    %117 = arith.addf %116, %115 : vector<16x128xf32>
    %118 = arith.divf %116, %117 : vector<16x128xf32>
    %119 = vector.extract_strided_slice %102 {offsets = [0, 256], sizes = [16, 128], strides = [1, 1]} : vector<16x384xf32> to vector<16x128xf32>
    %120 = vector.extract_strided_slice %98 {offsets = [0, 256], sizes = [16, 128], strides = [1, 1]} : vector<16x384xf32> to vector<16x128xf32>
    %121 = vector.broadcast %6 : vector<1x128xf32> to vector<16x128xf32>
    %122 = arith.addf %120, %121 : vector<16x128xf32>
    %123 = arith.mulf %110, %122 : vector<16x128xf32>
    %124 = arith.addf %119, %123 : vector<16x128xf32>
    %125 = math.tanh %124 : vector<16x128xf32>
    %cst_37 = arith.constant 1.000000e+00 : f32
    %126 = vector.broadcast %cst_37 : f32 to vector<16x128xf32>
    %127 = arith.subf %126, %118 : vector<16x128xf32>
    %128 = arith.mulf %127, %125 : vector<16x128xf32>
    %129 = arith.mulf %118, %96 : vector<16x128xf32>
    %130 = arith.addf %128, %129 : vector<16x128xf32>
    %c8_i32_38 = arith.constant 8 : i32
    %131 = arith.muli %arg1, %c8_i32_38 : i32
    %132 = arith.addi %131, %c2_i32 : i32
    %133 = vector.broadcast %132 : i32 to vector<16x1xi32>
    %134 = arith.cmpi sgt, %9, %133 : vector<16x1xi32>
    %135 = vector.shape_cast %134 : vector<16x1xi1> to vector<16x1xi1>
    %136 = vector.broadcast %135 : vector<16x1xi1> to vector<16x128xi1>
    %137 = arith.select %136, %130, %96 : vector<16x128xi1>, vector<16x128xf32>
    %c0_39 = arith.constant 0 : index
    %c0_40 = arith.constant 0 : index
    %138 = vector.load %arg7[%c0_39, %c0_40] : memref<16x128xf32, #tpu.memory_space<vmem>>, vector<16x128xf32>
    tpu.vector_store %arg7[%c0_39, %c0_40], %137 {strides = array<i32>} : memref<16x128xf32, #tpu.memory_space<vmem>>, vector<16x128xf32>,
    %c3_i32 = arith.constant 3 : i32
    %c0_41 = arith.constant 0 : index
    %c0_42 = arith.constant 0 : index
    %139 = vector.load %arg7[%c0_41, %c0_42] : memref<16x128xf32, #tpu.memory_space<vmem>>, vector<16x128xf32>
    %140 = arith.truncf %139 : vector<16x128xf32> to vector<16x128xbf16>
    %cst_43 = arith.constant dense<0.000000e+00> : vector<16x384xf32>
    %141 = tpu.matmul %140, %4, %cst_43 {dimension_numbers = #tpu.dot_dimension_numbers<[1], [0], [0], [1], [0, 0, 1, 1], [], []>} : vector<16x128xbf16>, vector<128x384xbf16>, vector<16x384xf32> -> vector<16x384xf32>
    %142 = arith.index_cast %c3_i32 : i32 to index
    %c0_44 = arith.constant 0 : index
    %c0_45 = arith.constant 0 : index
    %143 = vector.load %arg2[%142, %c0_44, %c0_45] : memref<8x16x384xbf16, #tpu.memory_space<vmem>>, vector<1x16x384xbf16>
    %144 = vector.shape_cast %143 : vector<1x16x384xbf16> to vector<16x384xbf16>
    %145 = arith.extf %144 : vector<16x384xbf16> to vector<16x384xf32>
    %146 = vector.extract_strided_slice %145 {offsets = [0, 0], sizes = [16, 128], strides = [1, 1]} : vector<16x384xf32> to vector<16x128xf32>
    %147 = vector.extract_strided_slice %141 {offsets = [0, 0], sizes = [16, 128], strides = [1, 1]} : vector<16x384xf32> to vector<16x128xf32>
    %148 = arith.addf %146, %147 : vector<16x128xf32>
    %149 = arith.negf %148 : vector<16x128xf32>
    %150 = math.exp %149 : vector<16x128xf32>
    %cst_46 = arith.constant 1.000000e+00 : f32
    %151 = vector.broadcast %cst_46 : f32 to vector<16x128xf32>
    %152 = arith.addf %151, %150 : vector<16x128xf32>
    %153 = arith.divf %151, %152 : vector<16x128xf32>
    %154 = vector.extract_strided_slice %145 {offsets = [0, 128], sizes = [16, 128], strides = [1, 1]} : vector<16x384xf32> to vector<16x128xf32>
    %155 = vector.extract_strided_slice %141 {offsets = [0, 128], sizes = [16, 128], strides = [1, 1]} : vector<16x384xf32> to vector<16x128xf32>
    %156 = arith.addf %154, %155 : vector<16x128xf32>
    %157 = arith.negf %156 : vector<16x128xf32>
    %158 = math.exp %157 : vector<16x128xf32>
    %cst_47 = arith.constant 1.000000e+00 : f32
    %159 = vector.broadcast %cst_47 : f32 to vector<16x128xf32>
    %160 = arith.addf %159, %158 : vector<16x128xf32>
    %161 = arith.divf %159, %160 : vector<16x128xf32>
    %162 = vector.extract_strided_slice %145 {offsets = [0, 256], sizes = [16, 128], strides = [1, 1]} : vector<16x384xf32> to vector<16x128xf32>
    %163 = vector.extract_strided_slice %141 {offsets = [0, 256], sizes = [16, 128], strides = [1, 1]} : vector<16x384xf32> to vector<16x128xf32>
    %164 = vector.broadcast %6 : vector<1x128xf32> to vector<16x128xf32>
    %165 = arith.addf %163, %164 : vector<16x128xf32>
    %166 = arith.mulf %153, %165 : vector<16x128xf32>
    %167 = arith.addf %162, %166 : vector<16x128xf32>
    %168 = math.tanh %167 : vector<16x128xf32>
    %cst_48 = arith.constant 1.000000e+00 : f32
    %169 = vector.broadcast %cst_48 : f32 to vector<16x128xf32>
    %170 = arith.subf %169, %161 : vector<16x128xf32>
    %171 = arith.mulf %170, %168 : vector<16x128xf32>
    %172 = arith.mulf %161, %139 : vector<16x128xf32>
    %173 = arith.addf %171, %172 : vector<16x128xf32>
    %c8_i32_49 = arith.constant 8 : i32
    %174 = arith.muli %arg1, %c8_i32_49 : i32
    %175 = arith.addi %174, %c3_i32 : i32
    %176 = vector.broadcast %175 : i32 to vector<16x1xi32>
    %177 = arith.cmpi sgt, %9, %176 : vector<16x1xi32>
    %178 = vector.shape_cast %177 : vector<16x1xi1> to vector<16x1xi1>
    %179 = vector.broadcast %178 : vector<16x1xi1> to vector<16x128xi1>
    %180 = arith.select %179, %173, %139 : vector<16x128xi1>, vector<16x128xf32>
    %c0_50 = arith.constant 0 : index
    %c0_51 = arith.constant 0 : index
    %181 = vector.load %arg7[%c0_50, %c0_51] : memref<16x128xf32, #tpu.memory_space<vmem>>, vector<16x128xf32>
    tpu.vector_store %arg7[%c0_50, %c0_51], %180 {strides = array<i32>} : memref<16x128xf32, #tpu.memory_space<vmem>>, vector<16x128xf32>,
    %c4_i32 = arith.constant 4 : i32
    %c0_52 = arith.constant 0 : index
    %c0_53 = arith.constant 0 : index
    %182 = vector.load %arg7[%c0_52, %c0_53] : memref<16x128xf32, #tpu.memory_space<vmem>>, vector<16x128xf32>
    %183 = arith.truncf %182 : vector<16x128xf32> to vector<16x128xbf16>
    %cst_54 = arith.constant dense<0.000000e+00> : vector<16x384xf32>
    %184 = tpu.matmul %183, %4, %cst_54 {dimension_numbers = #tpu.dot_dimension_numbers<[1], [0], [0], [1], [0, 0, 1, 1], [], []>} : vector<16x128xbf16>, vector<128x384xbf16>, vector<16x384xf32> -> vector<16x384xf32>
    %185 = arith.index_cast %c4_i32 : i32 to index
    %c0_55 = arith.constant 0 : index
    %c0_56 = arith.constant 0 : index
    %186 = vector.load %arg2[%185, %c0_55, %c0_56] : memref<8x16x384xbf16, #tpu.memory_space<vmem>>, vector<1x16x384xbf16>
    %187 = vector.shape_cast %186 : vector<1x16x384xbf16> to vector<16x384xbf16>
    %188 = arith.extf %187 : vector<16x384xbf16> to vector<16x384xf32>
    %189 = vector.extract_strided_slice %188 {offsets = [0, 0], sizes = [16, 128], strides = [1, 1]} : vector<16x384xf32> to vector<16x128xf32>
    %190 = vector.extract_strided_slice %184 {offsets = [0, 0], sizes = [16, 128], strides = [1, 1]} : vector<16x384xf32> to vector<16x128xf32>
    %191 = arith.addf %189, %190 : vector<16x128xf32>
    %192 = arith.negf %191 : vector<16x128xf32>
    %193 = math.exp %192 : vector<16x128xf32>
    %cst_57 = arith.constant 1.000000e+00 : f32
    %194 = vector.broadcast %cst_57 : f32 to vector<16x128xf32>
    %195 = arith.addf %194, %193 : vector<16x128xf32>
    %196 = arith.divf %194, %195 : vector<16x128xf32>
    %197 = vector.extract_strided_slice %188 {offsets = [0, 128], sizes = [16, 128], strides = [1, 1]} : vector<16x384xf32> to vector<16x128xf32>
    %198 = vector.extract_strided_slice %184 {offsets = [0, 128], sizes = [16, 128], strides = [1, 1]} : vector<16x384xf32> to vector<16x128xf32>
    %199 = arith.addf %197, %198 : vector<16x128xf32>
    %200 = arith.negf %199 : vector<16x128xf32>
    %201 = math.exp %200 : vector<16x128xf32>
    %cst_58 = arith.constant 1.000000e+00 : f32
    %202 = vector.broadcast %cst_58 : f32 to vector<16x128xf32>
    %203 = arith.addf %202, %201 : vector<16x128xf32>
    %204 = arith.divf %202, %203 : vector<16x128xf32>
    %205 = vector.extract_strided_slice %188 {offsets = [0, 256], sizes = [16, 128], strides = [1, 1]} : vector<16x384xf32> to vector<16x128xf32>
    %206 = vector.extract_strided_slice %184 {offsets = [0, 256], sizes = [16, 128], strides = [1, 1]} : vector<16x384xf32> to vector<16x128xf32>
    %207 = vector.broadcast %6 : vector<1x128xf32> to vector<16x128xf32>
    %208 = arith.addf %206, %207 : vector<16x128xf32>
    %209 = arith.mulf %196, %208 : vector<16x128xf32>
    %210 = arith.addf %205, %209 : vector<16x128xf32>
    %211 = math.tanh %210 : vector<16x128xf32>
    %cst_59 = arith.constant 1.000000e+00 : f32
    %212 = vector.broadcast %cst_59 : f32 to vector<16x128xf32>
    %213 = arith.subf %212, %204 : vector<16x128xf32>
    %214 = arith.mulf %213, %211 : vector<16x128xf32>
    %215 = arith.mulf %204, %182 : vector<16x128xf32>
    %216 = arith.addf %214, %215 : vector<16x128xf32>
    %c8_i32_60 = arith.constant 8 : i32
    %217 = arith.muli %arg1, %c8_i32_60 : i32
    %218 = arith.addi %217, %c4_i32 : i32
    %219 = vector.broadcast %218 : i32 to vector<16x1xi32>
    %220 = arith.cmpi sgt, %9, %219 : vector<16x1xi32>
    %221 = vector.shape_cast %220 : vector<16x1xi1> to vector<16x1xi1>
    %222 = vector.broadcast %221 : vector<16x1xi1> to vector<16x128xi1>
    %223 = arith.select %222, %216, %182 : vector<16x128xi1>, vector<16x128xf32>
    %c0_61 = arith.constant 0 : index
    %c0_62 = arith.constant 0 : index
    %224 = vector.load %arg7[%c0_61, %c0_62] : memref<16x128xf32, #tpu.memory_space<vmem>>, vector<16x128xf32>
    tpu.vector_store %arg7[%c0_61, %c0_62], %223 {strides = array<i32>} : memref<16x128xf32, #tpu.memory_space<vmem>>, vector<16x128xf32>,
    %c5_i32 = arith.constant 5 : i32
    %c0_63 = arith.constant 0 : index
    %c0_64 = arith.constant 0 : index
    %225 = vector.load %arg7[%c0_63, %c0_64] : memref<16x128xf32, #tpu.memory_space<vmem>>, vector<16x128xf32>
    %226 = arith.truncf %225 : vector<16x128xf32> to vector<16x128xbf16>
    %cst_65 = arith.constant dense<0.000000e+00> : vector<16x384xf32>
    %227 = tpu.matmul %226, %4, %cst_65 {dimension_numbers = #tpu.dot_dimension_numbers<[1], [0], [0], [1], [0, 0, 1, 1], [], []>} : vector<16x128xbf16>, vector<128x384xbf16>, vector<16x384xf32> -> vector<16x384xf32>
    %228 = arith.index_cast %c5_i32 : i32 to index
    %c0_66 = arith.constant 0 : index
    %c0_67 = arith.constant 0 : index
    %229 = vector.load %arg2[%228, %c0_66, %c0_67] : memref<8x16x384xbf16, #tpu.memory_space<vmem>>, vector<1x16x384xbf16>
    %230 = vector.shape_cast %229 : vector<1x16x384xbf16> to vector<16x384xbf16>
    %231 = arith.extf %230 : vector<16x384xbf16> to vector<16x384xf32>
    %232 = vector.extract_strided_slice %231 {offsets = [0, 0], sizes = [16, 128], strides = [1, 1]} : vector<16x384xf32> to vector<16x128xf32>
    %233 = vector.extract_strided_slice %227 {offsets = [0, 0], sizes = [16, 128], strides = [1, 1]} : vector<16x384xf32> to vector<16x128xf32>
    %234 = arith.addf %232, %233 : vector<16x128xf32>
    %235 = arith.negf %234 : vector<16x128xf32>
    %236 = math.exp %235 : vector<16x128xf32>
    %cst_68 = arith.constant 1.000000e+00 : f32
    %237 = vector.broadcast %cst_68 : f32 to vector<16x128xf32>
    %238 = arith.addf %237, %236 : vector<16x128xf32>
    %239 = arith.divf %237, %238 : vector<16x128xf32>
    %240 = vector.extract_strided_slice %231 {offsets = [0, 128], sizes = [16, 128], strides = [1, 1]} : vector<16x384xf32> to vector<16x128xf32>
    %241 = vector.extract_strided_slice %227 {offsets = [0, 128], sizes = [16, 128], strides = [1, 1]} : vector<16x384xf32> to vector<16x128xf32>
    %242 = arith.addf %240, %241 : vector<16x128xf32>
    %243 = arith.negf %242 : vector<16x128xf32>
    %244 = math.exp %243 : vector<16x128xf32>
    %cst_69 = arith.constant 1.000000e+00 : f32
    %245 = vector.broadcast %cst_69 : f32 to vector<16x128xf32>
    %246 = arith.addf %245, %244 : vector<16x128xf32>
    %247 = arith.divf %245, %246 : vector<16x128xf32>
    %248 = vector.extract_strided_slice %231 {offsets = [0, 256], sizes = [16, 128], strides = [1, 1]} : vector<16x384xf32> to vector<16x128xf32>
    %249 = vector.extract_strided_slice %227 {offsets = [0, 256], sizes = [16, 128], strides = [1, 1]} : vector<16x384xf32> to vector<16x128xf32>
    %250 = vector.broadcast %6 : vector<1x128xf32> to vector<16x128xf32>
    %251 = arith.addf %249, %250 : vector<16x128xf32>
    %252 = arith.mulf %239, %251 : vector<16x128xf32>
    %253 = arith.addf %248, %252 : vector<16x128xf32>
    %254 = math.tanh %253 : vector<16x128xf32>
    %cst_70 = arith.constant 1.000000e+00 : f32
    %255 = vector.broadcast %cst_70 : f32 to vector<16x128xf32>
    %256 = arith.subf %255, %247 : vector<16x128xf32>
    %257 = arith.mulf %256, %254 : vector<16x128xf32>
    %258 = arith.mulf %247, %225 : vector<16x128xf32>
    %259 = arith.addf %257, %258 : vector<16x128xf32>
    %c8_i32_71 = arith.constant 8 : i32
    %260 = arith.muli %arg1, %c8_i32_71 : i32
    %261 = arith.addi %260, %c5_i32 : i32
    %262 = vector.broadcast %261 : i32 to vector<16x1xi32>
    %263 = arith.cmpi sgt, %9, %262 : vector<16x1xi32>
    %264 = vector.shape_cast %263 : vector<16x1xi1> to vector<16x1xi1>
    %265 = vector.broadcast %264 : vector<16x1xi1> to vector<16x128xi1>
    %266 = arith.select %265, %259, %225 : vector<16x128xi1>, vector<16x128xf32>
    %c0_72 = arith.constant 0 : index
    %c0_73 = arith.constant 0 : index
    %267 = vector.load %arg7[%c0_72, %c0_73] : memref<16x128xf32, #tpu.memory_space<vmem>>, vector<16x128xf32>
    tpu.vector_store %arg7[%c0_72, %c0_73], %266 {strides = array<i32>} : memref<16x128xf32, #tpu.memory_space<vmem>>, vector<16x128xf32>,
    %c6_i32 = arith.constant 6 : i32
    %c0_74 = arith.constant 0 : index
    %c0_75 = arith.constant 0 : index
    %268 = vector.load %arg7[%c0_74, %c0_75] : memref<16x128xf32, #tpu.memory_space<vmem>>, vector<16x128xf32>
    %269 = arith.truncf %268 : vector<16x128xf32> to vector<16x128xbf16>
    %cst_76 = arith.constant dense<0.000000e+00> : vector<16x384xf32>
    %270 = tpu.matmul %269, %4, %cst_76 {dimension_numbers = #tpu.dot_dimension_numbers<[1], [0], [0], [1], [0, 0, 1, 1], [], []>} : vector<16x128xbf16>, vector<128x384xbf16>, vector<16x384xf32> -> vector<16x384xf32>
    %271 = arith.index_cast %c6_i32 : i32 to index
    %c0_77 = arith.constant 0 : index
    %c0_78 = arith.constant 0 : index
    %272 = vector.load %arg2[%271, %c0_77, %c0_78] : memref<8x16x384xbf16, #tpu.memory_space<vmem>>, vector<1x16x384xbf16>
    %273 = vector.shape_cast %272 : vector<1x16x384xbf16> to vector<16x384xbf16>
    %274 = arith.extf %273 : vector<16x384xbf16> to vector<16x384xf32>
    %275 = vector.extract_strided_slice %274 {offsets = [0, 0], sizes = [16, 128], strides = [1, 1]} : vector<16x384xf32> to vector<16x128xf32>
    %276 = vector.extract_strided_slice %270 {offsets = [0, 0], sizes = [16, 128], strides = [1, 1]} : vector<16x384xf32> to vector<16x128xf32>
    %277 = arith.addf %275, %276 : vector<16x128xf32>
    %278 = arith.negf %277 : vector<16x128xf32>
    %279 = math.exp %278 : vector<16x128xf32>
    %cst_79 = arith.constant 1.000000e+00 : f32
    %280 = vector.broadcast %cst_79 : f32 to vector<16x128xf32>
    %281 = arith.addf %280, %279 : vector<16x128xf32>
    %282 = arith.divf %280, %281 : vector<16x128xf32>
    %283 = vector.extract_strided_slice %274 {offsets = [0, 128], sizes = [16, 128], strides = [1, 1]} : vector<16x384xf32> to vector<16x128xf32>
    %284 = vector.extract_strided_slice %270 {offsets = [0, 128], sizes = [16, 128], strides = [1, 1]} : vector<16x384xf32> to vector<16x128xf32>
    %285 = arith.addf %283, %284 : vector<16x128xf32>
    %286 = arith.negf %285 : vector<16x128xf32>
    %287 = math.exp %286 : vector<16x128xf32>
    %cst_80 = arith.constant 1.000000e+00 : f32
    %288 = vector.broadcast %cst_80 : f32 to vector<16x128xf32>
    %289 = arith.addf %288, %287 : vector<16x128xf32>
    %290 = arith.divf %288, %289 : vector<16x128xf32>
    %291 = vector.extract_strided_slice %274 {offsets = [0, 256], sizes = [16, 128], strides = [1, 1]} : vector<16x384xf32> to vector<16x128xf32>
    %292 = vector.extract_strided_slice %270 {offsets = [0, 256], sizes = [16, 128], strides = [1, 1]} : vector<16x384xf32> to vector<16x128xf32>
    %293 = vector.broadcast %6 : vector<1x128xf32> to vector<16x128xf32>
    %294 = arith.addf %292, %293 : vector<16x128xf32>
    %295 = arith.mulf %282, %294 : vector<16x128xf32>
    %296 = arith.addf %291, %295 : vector<16x128xf32>
    %297 = math.tanh %296 : vector<16x128xf32>
    %cst_81 = arith.constant 1.000000e+00 : f32
    %298 = vector.broadcast %cst_81 : f32 to vector<16x128xf32>
    %299 = arith.subf %298, %290 : vector<16x128xf32>
    %300 = arith.mulf %299, %297 : vector<16x128xf32>
    %301 = arith.mulf %290, %268 : vector<16x128xf32>
    %302 = arith.addf %300, %301 : vector<16x128xf32>
    %c8_i32_82 = arith.constant 8 : i32
    %303 = arith.muli %arg1, %c8_i32_82 : i32
    %304 = arith.addi %303, %c6_i32 : i32
    %305 = vector.broadcast %304 : i32 to vector<16x1xi32>
    %306 = arith.cmpi sgt, %9, %305 : vector<16x1xi32>
    %307 = vector.shape_cast %306 : vector<16x1xi1> to vector<16x1xi1>
    %308 = vector.broadcast %307 : vector<16x1xi1> to vector<16x128xi1>
    %309 = arith.select %308, %302, %268 : vector<16x128xi1>, vector<16x128xf32>
    %c0_83 = arith.constant 0 : index
    %c0_84 = arith.constant 0 : index
    %310 = vector.load %arg7[%c0_83, %c0_84] : memref<16x128xf32, #tpu.memory_space<vmem>>, vector<16x128xf32>
    tpu.vector_store %arg7[%c0_83, %c0_84], %309 {strides = array<i32>} : memref<16x128xf32, #tpu.memory_space<vmem>>, vector<16x128xf32>,
    %c7_i32 = arith.constant 7 : i32
    %c0_85 = arith.constant 0 : index
    %c0_86 = arith.constant 0 : index
    %311 = vector.load %arg7[%c0_85, %c0_86] : memref<16x128xf32, #tpu.memory_space<vmem>>, vector<16x128xf32>
    %312 = arith.truncf %311 : vector<16x128xf32> to vector<16x128xbf16>
    %cst_87 = arith.constant dense<0.000000e+00> : vector<16x384xf32>
    %313 = tpu.matmul %312, %4, %cst_87 {dimension_numbers = #tpu.dot_dimension_numbers<[1], [0], [0], [1], [0, 0, 1, 1], [], []>} : vector<16x128xbf16>, vector<128x384xbf16>, vector<16x384xf32> -> vector<16x384xf32>
    %314 = arith.index_cast %c7_i32 : i32 to index
    %c0_88 = arith.constant 0 : index
    %c0_89 = arith.constant 0 : index
    %315 = vector.load %arg2[%314, %c0_88, %c0_89] : memref<8x16x384xbf16, #tpu.memory_space<vmem>>, vector<1x16x384xbf16>
    %316 = vector.shape_cast %315 : vector<1x16x384xbf16> to vector<16x384xbf16>
    %317 = arith.extf %316 : vector<16x384xbf16> to vector<16x384xf32>
    %318 = vector.extract_strided_slice %317 {offsets = [0, 0], sizes = [16, 128], strides = [1, 1]} : vector<16x384xf32> to vector<16x128xf32>
    %319 = vector.extract_strided_slice %313 {offsets = [0, 0], sizes = [16, 128], strides = [1, 1]} : vector<16x384xf32> to vector<16x128xf32>
    %320 = arith.addf %318, %319 : vector<16x128xf32>
    %321 = arith.negf %320 : vector<16x128xf32>
    %322 = math.exp %321 : vector<16x128xf32>
    %cst_90 = arith.constant 1.000000e+00 : f32
    %323 = vector.broadcast %cst_90 : f32 to vector<16x128xf32>
    %324 = arith.addf %323, %322 : vector<16x128xf32>
    %325 = arith.divf %323, %324 : vector<16x128xf32>
    %326 = vector.extract_strided_slice %317 {offsets = [0, 128], sizes = [16, 128], strides = [1, 1]} : vector<16x384xf32> to vector<16x128xf32>
    %327 = vector.extract_strided_slice %313 {offsets = [0, 128], sizes = [16, 128], strides = [1, 1]} : vector<16x384xf32> to vector<16x128xf32>
    %328 = arith.addf %326, %327 : vector<16x128xf32>
    %329 = arith.negf %328 : vector<16x128xf32>
    %330 = math.exp %329 : vector<16x128xf32>
    %cst_91 = arith.constant 1.000000e+00 : f32
    %331 = vector.broadcast %cst_91 : f32 to vector<16x128xf32>
    %332 = arith.addf %331, %330 : vector<16x128xf32>
    %333 = arith.divf %331, %332 : vector<16x128xf32>
    %334 = vector.extract_strided_slice %317 {offsets = [0, 256], sizes = [16, 128], strides = [1, 1]} : vector<16x384xf32> to vector<16x128xf32>
    %335 = vector.extract_strided_slice %313 {offsets = [0, 256], sizes = [16, 128], strides = [1, 1]} : vector<16x384xf32> to vector<16x128xf32>
    %336 = vector.broadcast %6 : vector<1x128xf32> to vector<16x128xf32>
    %337 = arith.addf %335, %336 : vector<16x128xf32>
    %338 = arith.mulf %325, %337 : vector<16x128xf32>
    %339 = arith.addf %334, %338 : vector<16x128xf32>
    %340 = math.tanh %339 : vector<16x128xf32>
    %cst_92 = arith.constant 1.000000e+00 : f32
    %341 = vector.broadcast %cst_92 : f32 to vector<16x128xf32>
    %342 = arith.subf %341, %333 : vector<16x128xf32>
    %343 = arith.mulf %342, %340 : vector<16x128xf32>
    %344 = arith.mulf %333, %311 : vector<16x128xf32>
    %345 = arith.addf %343, %344 : vector<16x128xf32>
    %c8_i32_93 = arith.constant 8 : i32
    %346 = arith.muli %arg1, %c8_i32_93 : i32
    %347 = arith.addi %346, %c7_i32 : i32
    %348 = vector.broadcast %347 : i32 to vector<16x1xi32>
    %349 = arith.cmpi sgt, %9, %348 : vector<16x1xi32>
    %350 = vector.shape_cast %349 : vector<16x1xi1> to vector<16x1xi1>
    %351 = vector.broadcast %350 : vector<16x1xi1> to vector<16x128xi1>
    %352 = arith.select %351, %345, %311 : vector<16x128xi1>, vector<16x128xf32>
    %c0_94 = arith.constant 0 : index
    %c0_95 = arith.constant 0 : index
    %353 = vector.load %arg7[%c0_94, %c0_95] : memref<16x128xf32, #tpu.memory_space<vmem>>, vector<16x128xf32>
    tpu.vector_store %arg7[%c0_94, %c0_95], %352 {strides = array<i32>} : memref<16x128xf32, #tpu.memory_space<vmem>>, vector<16x128xf32>,
    %c8_i32_96 = arith.constant 8 : i32
    %c0_i32_97 = arith.constant 0 : i32
    %354 = arith.cmpi eq, %arg1, %c0_i32_97 : i32
    %355 = arith.extui %354 : i1 to i32
    %c0_i32_98 = arith.constant 0 : i32
    %356 = arith.cmpi ne, %355, %c0_i32_98 : i32
    scf.if %356 {
      %c0_99 = arith.constant 0 : index
      %c0_100 = arith.constant 0 : index
      %357 = vector.load %arg7[%c0_99, %c0_100] : memref<16x128xf32, #tpu.memory_space<vmem>>, vector<16x128xf32>
      %c0_101 = arith.constant 0 : index
      %c0_102 = arith.constant 0 : index
      %c0_103 = arith.constant 0 : index
      %358 = vector.load %arg6[%c0_101, %c0_102, %c0_103] : memref<1x16x128xf32, #tpu.memory_space<vmem>>, vector<1x16x128xf32>
      %359 = vector.shape_cast %358 : vector<1x16x128xf32> to vector<16x128xf32>
      %360 = vector.shape_cast %357 : vector<16x128xf32> to vector<1x16x128xf32>
      tpu.vector_store %arg6[%c0_101, %c0_102, %c0_103], %360 {strides = array<i32>} : memref<1x16x128xf32, #tpu.memory_space<vmem>>, vector<1x16x128xf32>,
    } else {
    }
    return
  }
  func.func @transform_0(%arg0: i32, %arg1: i32) -> (i32, i32, i32) {
    %c0_i32 = arith.constant 0 : i32
    %c0_i32_0 = arith.constant 0 : i32
    return %arg1, %c0_i32, %arg0 : i32, i32, i32
  }
  func.func @transform_1(%arg0: i32, %arg1: i32) -> (i32, i32, i32) {
    %c0_i32 = arith.constant 0 : i32
    %c0_i32_0 = arith.constant 0 : i32
    %c0_i32_1 = arith.constant 0 : i32
    return %arg0, %c0_i32, %c0_i32_0 : i32, i32, i32
  }
  func.func @transform_2(%arg0: i32, %arg1: i32) -> (i32, i32, i32) {
    %c0_i32 = arith.constant 0 : i32
    %c0_i32_0 = arith.constant 0 : i32
    %c0_i32_1 = arith.constant 0 : i32
    return %arg0, %c0_i32, %c0_i32_0 : i32, i32, i32
  }
  func.func @transform_3(%arg0: i32, %arg1: i32) -> (i32, i32) {
    %c0_i32 = arith.constant 0 : i32
    %c0_i32_0 = arith.constant 0 : i32
    %c0_i32_1 = arith.constant 0 : i32
    return %c0_i32, %c0_i32_0 : i32, i32
  }
  func.func @transform_4(%arg0: i32, %arg1: i32) -> (i32, i32, i32) {
    %c0_i32 = arith.constant 0 : i32
    %c0_i32_0 = arith.constant 0 : i32
    %c0_i32_1 = arith.constant 0 : i32
    return %arg0, %c0_i32, %c0_i32_0 : i32, i32, i32
  }
}

module attributes {stable_mosaic.version = 11 : i64} {
  func.func @_gru_kernel(%arg0: i32, %arg1: i32, %arg2: memref<2x16x384xbf16, #tpu.memory_space<vmem>>, %arg3: memref<1x128x384xbf16, #tpu.memory_space<vmem>>, %arg4: memref<1x1x128xf32, #tpu.memory_space<vmem>>, %arg5: memref<1x2x16x128xbf16, #tpu.memory_space<vmem>>, %arg6: memref<16x128xf32, #tpu.memory_space<vmem>>) attributes {dimension_semantics = [#tpu.dimension_semantics<parallel>, #tpu.dimension_semantics<arbitrary>], iteration_bounds = array<i64: 2, 1>, scalar_prefetch = 0 : i64, scratch_operands = 1 : i64, tpu.core_type = #tpu.core_type<tc>, window_params = [{transform_indices = @transform_0, window_bounds = array<i64: 2, 16, 384>}, {transform_indices = @transform_1, window_bounds = array<i64: 1, 128, 384>}, {transform_indices = @transform_2, window_bounds = array<i64: 1, 1, 128>}, {transform_indices = @transform_3, window_bounds = array<i64: 1, 2, 16, 128>}]} {
    %c0_i32 = arith.constant 0 : i32
    %0 = arith.cmpi eq, %arg1, %c0_i32 : i32
    %1 = arith.extui %0 : i1 to i32
    %c0_i32_0 = arith.constant 0 : i32
    %2 = arith.cmpi ne, %1, %c0_i32_0 : i32
    scf.if %2 {
      %cst_36 = arith.constant 0.000000e+00 : f32
      %97 = vector.broadcast %cst_36 : f32 to vector<16x128xf32>
      %c0_37 = arith.constant 0 : index
      %c0_38 = arith.constant 0 : index
      %98 = vector.load %arg6[%c0_37, %c0_38] : memref<16x128xf32, #tpu.memory_space<vmem>>, vector<16x128xf32>
      tpu.vector_store %arg6[%c0_37, %c0_38], %97 {strides = array<i32>} : memref<16x128xf32, #tpu.memory_space<vmem>>, vector<16x128xf32>,
    } else {
    }
    %c0 = arith.constant 0 : index
    %c0_1 = arith.constant 0 : index
    %c0_2 = arith.constant 0 : index
    %3 = vector.load %arg3[%c0, %c0_1, %c0_2] : memref<1x128x384xbf16, #tpu.memory_space<vmem>>, vector<1x128x384xbf16>
    %4 = vector.shape_cast %3 : vector<1x128x384xbf16> to vector<128x384xbf16>
    %c0_3 = arith.constant 0 : index
    %c0_4 = arith.constant 0 : index
    %c0_5 = arith.constant 0 : index
    %5 = vector.load %arg4[%c0_3, %c0_4, %c0_5] : memref<1x1x128xf32, #tpu.memory_space<vmem>>, vector<1x1x128xf32>
    %6 = vector.shape_cast %5 : vector<1x1x128xf32> to vector<1x128xf32>
    %c0_i32_6 = arith.constant 0 : i32
    %c2_i32 = arith.constant 2 : i32
    %7 = arith.muli %c2_i32, %c0_i32_6 : i32
    %c1_i32 = arith.constant 1 : i32
    %8 = arith.subi %c1_i32, %7 : i32
    %9 = arith.muli %arg0, %8 : i32
    %10 = arith.addi %c0_i32_6, %9 : i32
    %c0_7 = arith.constant 0 : index
    %c0_8 = arith.constant 0 : index
    %11 = vector.load %arg6[%c0_7, %c0_8] : memref<16x128xf32, #tpu.memory_space<vmem>>, vector<16x128xf32>
    %12 = arith.truncf %11 : vector<16x128xf32> to vector<16x128xbf16>
    %cst = arith.constant dense<0.000000e+00> : vector<16x384xf32>
    %13 = tpu.matmul %12, %4, %cst {dimension_numbers = #tpu.dot_dimension_numbers<[1], [0], [0], [1], [0, 0, 1, 1], [], []>} : vector<16x128xbf16>, vector<128x384xbf16>, vector<16x384xf32> -> vector<16x384xf32>
    %14 = arith.index_cast %10 : i32 to index
    %c0_9 = arith.constant 0 : index
    %c0_10 = arith.constant 0 : index
    %15 = vector.load %arg2[%14, %c0_9, %c0_10] : memref<2x16x384xbf16, #tpu.memory_space<vmem>>, vector<1x16x384xbf16>
    %16 = vector.shape_cast %15 : vector<1x16x384xbf16> to vector<16x384xbf16>
    %17 = arith.extf %16 : vector<16x384xbf16> to vector<16x384xf32>
    %18 = vector.extract_strided_slice %17 {offsets = [0, 0], sizes = [16, 128], strides = [1, 1]} : vector<16x384xf32> to vector<16x128xf32>
    %19 = vector.extract_strided_slice %13 {offsets = [0, 0], sizes = [16, 128], strides = [1, 1]} : vector<16x384xf32> to vector<16x128xf32>
    %20 = arith.addf %18, %19 : vector<16x128xf32>
    %21 = arith.negf %20 : vector<16x128xf32>
    %22 = math.exp %21 : vector<16x128xf32>
    %cst_11 = arith.constant 1.000000e+00 : f32
    %23 = vector.broadcast %cst_11 : f32 to vector<16x128xf32>
    %24 = arith.addf %23, %22 : vector<16x128xf32>
    %25 = arith.divf %23, %24 : vector<16x128xf32>
    %26 = vector.extract_strided_slice %17 {offsets = [0, 128], sizes = [16, 128], strides = [1, 1]} : vector<16x384xf32> to vector<16x128xf32>
    %27 = vector.extract_strided_slice %13 {offsets = [0, 128], sizes = [16, 128], strides = [1, 1]} : vector<16x384xf32> to vector<16x128xf32>
    %28 = arith.addf %26, %27 : vector<16x128xf32>
    %29 = arith.negf %28 : vector<16x128xf32>
    %30 = math.exp %29 : vector<16x128xf32>
    %cst_12 = arith.constant 1.000000e+00 : f32
    %31 = vector.broadcast %cst_12 : f32 to vector<16x128xf32>
    %32 = arith.addf %31, %30 : vector<16x128xf32>
    %33 = arith.divf %31, %32 : vector<16x128xf32>
    %34 = vector.extract_strided_slice %17 {offsets = [0, 256], sizes = [16, 128], strides = [1, 1]} : vector<16x384xf32> to vector<16x128xf32>
    %35 = vector.extract_strided_slice %13 {offsets = [0, 256], sizes = [16, 128], strides = [1, 1]} : vector<16x384xf32> to vector<16x128xf32>
    %36 = vector.broadcast %6 : vector<1x128xf32> to vector<16x128xf32>
    %37 = arith.addf %35, %36 : vector<16x128xf32>
    %38 = arith.mulf %25, %37 : vector<16x128xf32>
    %39 = arith.addf %34, %38 : vector<16x128xf32>
    %40 = math.tanh %39 : vector<16x128xf32>
    %cst_13 = arith.constant 1.000000e+00 : f32
    %41 = vector.broadcast %cst_13 : f32 to vector<16x128xf32>
    %42 = arith.subf %41, %33 : vector<16x128xf32>
    %43 = arith.mulf %42, %40 : vector<16x128xf32>
    %44 = arith.mulf %33, %11 : vector<16x128xf32>
    %45 = arith.addf %43, %44 : vector<16x128xf32>
    %c0_14 = arith.constant 0 : index
    %c0_15 = arith.constant 0 : index
    %46 = vector.load %arg6[%c0_14, %c0_15] : memref<16x128xf32, #tpu.memory_space<vmem>>, vector<16x128xf32>
    tpu.vector_store %arg6[%c0_14, %c0_15], %45 {strides = array<i32>} : memref<16x128xf32, #tpu.memory_space<vmem>>, vector<16x128xf32>,
    %47 = arith.truncf %45 : vector<16x128xf32> to vector<16x128xbf16>
    %c0_16 = arith.constant 0 : index
    %48 = arith.index_cast %10 : i32 to index
    %c0_17 = arith.constant 0 : index
    %c0_18 = arith.constant 0 : index
    %49 = vector.load %arg5[%c0_16, %48, %c0_17, %c0_18] : memref<1x2x16x128xbf16, #tpu.memory_space<vmem>>, vector<1x1x16x128xbf16>
    %50 = vector.shape_cast %49 : vector<1x1x16x128xbf16> to vector<16x128xbf16>
    %51 = vector.shape_cast %47 : vector<16x128xbf16> to vector<1x1x16x128xbf16>
    tpu.vector_store %arg5[%c0_16, %48, %c0_17, %c0_18], %51 {strides = array<i32>} : memref<1x2x16x128xbf16, #tpu.memory_space<vmem>>, vector<1x1x16x128xbf16>,
    %c1_i32_19 = arith.constant 1 : i32
    %c2_i32_20 = arith.constant 2 : i32
    %52 = arith.muli %c2_i32_20, %c1_i32_19 : i32
    %c1_i32_21 = arith.constant 1 : i32
    %53 = arith.subi %c1_i32_21, %52 : i32
    %54 = arith.muli %arg0, %53 : i32
    %55 = arith.addi %c1_i32_19, %54 : i32
    %c0_22 = arith.constant 0 : index
    %c0_23 = arith.constant 0 : index
    %56 = vector.load %arg6[%c0_22, %c0_23] : memref<16x128xf32, #tpu.memory_space<vmem>>, vector<16x128xf32>
    %57 = arith.truncf %56 : vector<16x128xf32> to vector<16x128xbf16>
    %cst_24 = arith.constant dense<0.000000e+00> : vector<16x384xf32>
    %58 = tpu.matmul %57, %4, %cst_24 {dimension_numbers = #tpu.dot_dimension_numbers<[1], [0], [0], [1], [0, 0, 1, 1], [], []>} : vector<16x128xbf16>, vector<128x384xbf16>, vector<16x384xf32> -> vector<16x384xf32>
    %59 = arith.index_cast %55 : i32 to index
    %c0_25 = arith.constant 0 : index
    %c0_26 = arith.constant 0 : index
    %60 = vector.load %arg2[%59, %c0_25, %c0_26] : memref<2x16x384xbf16, #tpu.memory_space<vmem>>, vector<1x16x384xbf16>
    %61 = vector.shape_cast %60 : vector<1x16x384xbf16> to vector<16x384xbf16>
    %62 = arith.extf %61 : vector<16x384xbf16> to vector<16x384xf32>
    %63 = vector.extract_strided_slice %62 {offsets = [0, 0], sizes = [16, 128], strides = [1, 1]} : vector<16x384xf32> to vector<16x128xf32>
    %64 = vector.extract_strided_slice %58 {offsets = [0, 0], sizes = [16, 128], strides = [1, 1]} : vector<16x384xf32> to vector<16x128xf32>
    %65 = arith.addf %63, %64 : vector<16x128xf32>
    %66 = arith.negf %65 : vector<16x128xf32>
    %67 = math.exp %66 : vector<16x128xf32>
    %cst_27 = arith.constant 1.000000e+00 : f32
    %68 = vector.broadcast %cst_27 : f32 to vector<16x128xf32>
    %69 = arith.addf %68, %67 : vector<16x128xf32>
    %70 = arith.divf %68, %69 : vector<16x128xf32>
    %71 = vector.extract_strided_slice %62 {offsets = [0, 128], sizes = [16, 128], strides = [1, 1]} : vector<16x384xf32> to vector<16x128xf32>
    %72 = vector.extract_strided_slice %58 {offsets = [0, 128], sizes = [16, 128], strides = [1, 1]} : vector<16x384xf32> to vector<16x128xf32>
    %73 = arith.addf %71, %72 : vector<16x128xf32>
    %74 = arith.negf %73 : vector<16x128xf32>
    %75 = math.exp %74 : vector<16x128xf32>
    %cst_28 = arith.constant 1.000000e+00 : f32
    %76 = vector.broadcast %cst_28 : f32 to vector<16x128xf32>
    %77 = arith.addf %76, %75 : vector<16x128xf32>
    %78 = arith.divf %76, %77 : vector<16x128xf32>
    %79 = vector.extract_strided_slice %62 {offsets = [0, 256], sizes = [16, 128], strides = [1, 1]} : vector<16x384xf32> to vector<16x128xf32>
    %80 = vector.extract_strided_slice %58 {offsets = [0, 256], sizes = [16, 128], strides = [1, 1]} : vector<16x384xf32> to vector<16x128xf32>
    %81 = vector.broadcast %6 : vector<1x128xf32> to vector<16x128xf32>
    %82 = arith.addf %80, %81 : vector<16x128xf32>
    %83 = arith.mulf %70, %82 : vector<16x128xf32>
    %84 = arith.addf %79, %83 : vector<16x128xf32>
    %85 = math.tanh %84 : vector<16x128xf32>
    %cst_29 = arith.constant 1.000000e+00 : f32
    %86 = vector.broadcast %cst_29 : f32 to vector<16x128xf32>
    %87 = arith.subf %86, %78 : vector<16x128xf32>
    %88 = arith.mulf %87, %85 : vector<16x128xf32>
    %89 = arith.mulf %78, %56 : vector<16x128xf32>
    %90 = arith.addf %88, %89 : vector<16x128xf32>
    %c0_30 = arith.constant 0 : index
    %c0_31 = arith.constant 0 : index
    %91 = vector.load %arg6[%c0_30, %c0_31] : memref<16x128xf32, #tpu.memory_space<vmem>>, vector<16x128xf32>
    tpu.vector_store %arg6[%c0_30, %c0_31], %90 {strides = array<i32>} : memref<16x128xf32, #tpu.memory_space<vmem>>, vector<16x128xf32>,
    %92 = arith.truncf %90 : vector<16x128xf32> to vector<16x128xbf16>
    %c0_32 = arith.constant 0 : index
    %93 = arith.index_cast %55 : i32 to index
    %c0_33 = arith.constant 0 : index
    %c0_34 = arith.constant 0 : index
    %94 = vector.load %arg5[%c0_32, %93, %c0_33, %c0_34] : memref<1x2x16x128xbf16, #tpu.memory_space<vmem>>, vector<1x1x16x128xbf16>
    %95 = vector.shape_cast %94 : vector<1x1x16x128xbf16> to vector<16x128xbf16>
    %96 = vector.shape_cast %92 : vector<16x128xbf16> to vector<1x1x16x128xbf16>
    tpu.vector_store %arg5[%c0_32, %93, %c0_33, %c0_34], %96 {strides = array<i32>} : memref<1x2x16x128xbf16, #tpu.memory_space<vmem>>, vector<1x1x16x128xbf16>,
    %c2_i32_35 = arith.constant 2 : i32
    return
  }
  func.func @transform_0(%arg0: i32, %arg1: i32) -> (i32, i32, i32) {
    %c2_i32 = arith.constant 2 : i32
    %0 = arith.muli %c2_i32, %arg1 : i32
    %c0_i32 = arith.constant 0 : i32
    %1 = arith.subi %c0_i32, %0 : i32
    %2 = arith.muli %arg0, %1 : i32
    %3 = arith.addi %arg1, %2 : i32
    %c0_i32_0 = arith.constant 0 : i32
    %c0_i32_1 = arith.constant 0 : i32
    return %3, %c0_i32_0, %arg0 : i32, i32, i32
  }
  func.func @transform_1(%arg0: i32, %arg1: i32) -> (i32, i32, i32) {
    %c0_i32 = arith.constant 0 : i32
    %c0_i32_0 = arith.constant 0 : i32
    %c0_i32_1 = arith.constant 0 : i32
    return %arg0, %c0_i32, %c0_i32_0 : i32, i32, i32
  }
  func.func @transform_2(%arg0: i32, %arg1: i32) -> (i32, i32, i32) {
    %c0_i32 = arith.constant 0 : i32
    %c0_i32_0 = arith.constant 0 : i32
    %c0_i32_1 = arith.constant 0 : i32
    return %arg0, %c0_i32, %c0_i32_0 : i32, i32, i32
  }
  func.func @transform_3(%arg0: i32, %arg1: i32) -> (i32, i32, i32, i32) {
    %c2_i32 = arith.constant 2 : i32
    %0 = arith.muli %c2_i32, %arg1 : i32
    %c0_i32 = arith.constant 0 : i32
    %1 = arith.subi %c0_i32, %0 : i32
    %2 = arith.muli %arg0, %1 : i32
    %3 = arith.addi %arg1, %2 : i32
    %c0_i32_0 = arith.constant 0 : i32
    %c0_i32_1 = arith.constant 0 : i32
    %c0_i32_2 = arith.constant 0 : i32
    return %arg0, %3, %c0_i32_0, %c0_i32_1 : i32, i32, i32, i32
  }
}

</mosaic_0001>

<bundles_post_ra>
// kernel: shared_rnn_forward.2
= control target key start
LH: loop header
LB: loop body
LE: loop exit
PB: predicated region body
PF: predicated region fallthrough
CT: control target
= control target key end

     0   :  { %v2007_v1 = vmov 0.0   ;;  %v2008_v2 = vmov 0   ;;  %vm2009_vm0 = vmmov 0   ;;  %v2010_v31 = vmov 0.0|0.0   ;;  %s2781_s1 = inlined_call_operand.vmem [shape: bf16[1,128,384], index: 1, kind: input, shape index: {}]   ;;  %s2782_s3 = inlined_call_operand.vmem [shape: s32[16,128], index: 3, kind: input, shape index: {}]   ;;  %s2783_s0 = inlined_call_operand.vmem [shape: bf16[8,16,384], index: 0, kind: input, shape index: {}]   ;;  %s2784_s2 = inlined_call_operand.vmem [shape: f32[1,1,128], index: 2, kind: input, shape index: {}]   ;;  %s2785_s4 = inlined_call_operand.vmem [shape: f32[1,16,128], index: 4, kind: output, shape index: {}]  }
   0x1   :  { %v2039_v0 = vld [vmem:[%s2781_s1 + $0x4] ss:$12 sps:$4 sm:$0xff]   ;;  %1626 = vmatprep.subr.bf16.mxu1 %v2007_v1  ;;  %250 = vmatprep.mubr.bf16.mxu0 %v2008_v2  ;;  %v2046_v3 = vld [vmem:[%s2781_s1] ss:$12 sps:$4 sm:$0xff]   ;;  %v2060_v6 = vld [vmem:[%s2781_s1 + $0x1c] ss:$12 sps:$4 sm:$0xff]  }
   0x2   :  { %v2051_v4 = vld [vmem:[%s2782_s3] sm:$0xff]  ;;  %1642 = vmatprep.mubr.msk.bf16.mxu1 %vm2009_vm0, %v2007_v1  ;;  %218 = vmatprep.subr.bf16.mxu0 %v2039_v0  ;;  %v2071_v8 = vld [vmem:[%s2782_s3 + $0x8] sm:$0xff]  ;;  %v2089_v13 = vld [vmem:[%s2781_s1 + $0x30] ss:$12 sps:$4 sm:$0xff]  }
   0x3   :  { %v60_v5 = vshra.s32 %v2051_v4, 16  ;;  %v2065_v7 = vld [vmem:[%s2781_s1 + $0x18] ss:$12 sps:$4 sm:$0xff]   ;;  %219 = vmatpush1.bf16.msra.mxu0 %v2046_v3  ;;  %v74_v10 = vshra.s32 %v2071_v8, 16  ;;  %v2080_v11 = vld [vmem:[%s2781_s1 + $0x34] ss:$12 sps:$4 sm:$0xff]  }
   0x4   :  { %220 = vmatprep.subr.bf16.mxu0 %v2060_v6  ;;  %v2095_v14 = vld [vmem:[%s2781_s1 + $0x4c] ss:$12 sps:$4 sm:$0xff]   ;;  %v2101_v15 = vld [vmem:[%s2781_s1 + $0x8] ss:$12 sps:$4 sm:$0xff]   ;;  %v2113_v17 = vld [vmem:[%s2781_s1 + $0x64] ss:$12 sps:$4 sm:$0xff]  }
   0x5   :  { %v2073_v9 = vcvt.s32.f32 %v60_v5  ;;  %v2083_v12 = vcvt.s32.f32 %v74_v10  ;;  %v2107_v16 = vld [vmem:[%s2781_s1 + $0x48] ss:$12 sps:$4 sm:$0xff]   ;;  %1627 = vmatpush3.bf16.msra.mxu1 %v2101_v15  ;;  %v2120_v18 = vld [vmem:[%s2781_s1 + $0x20] ss:$12 sps:$4 sm:$0xff]   ;;  %v2138_v21 = vld [vmem:[%s2781_s1 + $0x38] ss:$12 sps:$4 sm:$0xff]  }
   0x6   :  { %1628 = vmatprep.subr.bf16.mxu1 %v2007_v1  ;;  %v2125_v19 = vld [vmem:[%s2781_s1 + $0x60] ss:$12 sps:$4 sm:$0xff]   ;;  %v2131_v20 = vld [vmem:[%s2781_s1 + $0x7c] ss:$12 sps:$4 sm:$0xff]   ;;  %v2145_v22 = vld [vmem:[%s2781_s1 + $0x78] ss:$12 sps:$4 sm:$0xff]  }
   0x7   :  { %63 = vmax.xlane.f32.xlu0 %v2073_v9  ;;  %221 = vmatpush1.bf16.msra.mxu0 %v2065_v7  ;;  %v2151_v23 = vld [vmem:[%s2781_s1 + $0x94] ss:$12 sps:$4 sm:$0xff]   ;;  %v2157_v24 = vld [vmem:[%s2781_s1 + $0x50] ss:$12 sps:$4 sm:$0xff]   ;;  %v2170_v26 = vld [vmem:[%s2781_s1 + $0xac] ss:$12 sps:$4 sm:$0xff]  }
   0x8   :  { %222 = vmatprep.subr.bf16.mxu0 %v2080_v11  ;;  %v2164_v25 = vld [vmem:[%s2781_s1 + $0x90] ss:$12 sps:$4 sm:$0xff]   ;;  %v2176_v27 = vld [vmem:[%s2781_s1 + $0x68] ss:$12 sps:$4 sm:$0xff]   ;;  %v2190_v29 = vld [vmem:[%s2781_s1 + $0x80] ss:$12 sps:$4 sm:$0xff]  }
   0x9   :  { %1629 = vmatpush3.bf16.msra.mxu1 %v2120_v18  ;;  %v2183_v28 = vld [vmem:[%s2781_s1 + $0xa8] ss:$12 sps:$4 sm:$0xff]   ;;  %v2198_v30 = vld [vmem:[%s2781_s1 + $0x98] ss:$12 sps:$4 sm:$0xff]   ;;  %v2208_v32 = vld [vmem:[%s2781_s1 + $0xb0] ss:$12 sps:$4 sm:$0xff]  }
   0xa   :  { %1630 = vmatprep.subr.bf16.mxu1 %v2007_v1  ;;  %v59_v33 = vand.u32 65535, %v2051_v4  ;;  %v73_v35 = vand.u32 65535, %v2071_v8  ;;  %v302_v41 = vld [vmem:[%s2783_s0] sm:$0xff]  ;;  %v304_v42 = vld [vmem:[%s2783_s0 + $0xc] sm:$0xff] }
   0xb   :  { %77 = vmax.xlane.f32.xlu0 %v2083_v12  ;;  %223 = vmatpush1.bf16.msra.mxu0 %v2089_v13  ;;  %v306_v43 = vunpack.c.l.bf16 %v302_v41  ;;  %v309_v44 = vunpack.c.l.bf16 %v304_v42  ;;  %v307_v46 = vunpack.c.h.bf16 %v302_v41  ;;  %v310_v50 = vunpack.c.h.bf16 %v304_v42  ;;  %v2265_v10 = vld [vmem:[%s2784_s2] ss:$0 sm:$0xff] }
   0xc   :  { %224 = vmatprep.subr.bf16.mxu0 %v2095_v14  ;;  %v61_v34 = vcvt.s32.f32 %v59_v33  ;;  %v75_v38 = vcvt.s32.f32 %v73_v35 }
   0xd   :  { %1631 = vmatpush3.bf16.msra.mxu1 %v2138_v21 }
   0xe   :  { %1632 = vmatprep.subr.bf16.mxu1 %v2007_v1 }
   0xf   :  { %225 = vmatpush1.bf16.msra.mxu0 %v2107_v16 }
  0x10   :  { %226 = vmatprep.subr.bf16.mxu0 %v2113_v17 }
  0x11   :  { %1633 = vmatpush3.bf16.msra.mxu1 %v2157_v24 }
  0x12   :  { %1634 = vmatprep.subr.bf16.mxu1 %v2007_v1 }
  0x13   :  { %227 = vmatpush1.bf16.msra.mxu0 %v2125_v19 }
  0x14   :  { %228 = vmatprep.subr.bf16.mxu0 %v2131_v20 }
  0x15   :  { %1635 = vmatpush3.bf16.msra.mxu1 %v2176_v27 }
  0x16   :  { %1636 = vmatprep.subr.bf16.mxu1 %v2007_v1 }
  0x17   :  { %229 = vmatpush1.bf16.msra.mxu0 %v2145_v22 }
  0x18   :  { %230 = vmatprep.subr.bf16.mxu0 %v2151_v23 }
  0x19   :  { %1637 = vmatpush3.bf16.msra.mxu1 %v2190_v29 }
  0x1a   :  { %1638 = vmatprep.subr.bf16.mxu1 %v2007_v1 }
  0x1b   :  { %231 = vmatpush1.bf16.msra.mxu0 %v2164_v25 }
  0x1c   :  { %232 = vmatprep.subr.bf16.mxu0 %v2170_v26 }
  0x1d   :  { %1639 = vmatpush3.bf16.msra.mxu1 %v2198_v30 }
  0x1e   :  { %1640 = vmatprep.subr.bf16.mxu1 %v2007_v1 }
  0x1f   :  { %233 = vmatpush1.bf16.msra.mxu0 %v2183_v28 }
  0x20   :  { %377 = vmatprep.subr.bf16.mxu0 %v2039_v0 }
  0x21   :  { %1641 = vmatpush3.bf16.msra.mxu1 %v2208_v32 }
  0x22   :  { %251 = vmatmul.mubr.bf16.vlgmr.msra.gmra.mrb[0].mxu0 %v2010_v31  ;;  %1646 = vmatprep.subr.bf16.mxu1 %v2007_v1 }
  0x23   :  { %378 = vmatpush1.bf16.msra.mxu0 %v2046_v3  ;;  %409 = vmatprep.mubr.bf16.mxu0 %v2008_v2 }
  0x24   :  { %379 = vmatprep.subr.bf16.mxu0 %v2060_v6  ;;  %1643 = vmatmul.mubr.bf16.vlgmr.msra.gmra.mrb[0].mxu1 %v2010_v31  ;;  %v303_v31 = vld [vmem:[%s2783_s0 + $0x8] ss:$12 sps:$4 sm:$0xff]  }
  0x25   :  { %1647 = vmatpush3.bf16.msra.mxu1 %v2101_v15  ;;  %1662 = vmatprep.mubr.msk.bf16.mxu1 %vm2009_vm0, %v2007_v1  ;;  %v311_v42 = vunpack.c.h.bf16 %v303_v31 }
  0x26   :  { %1648 = vmatprep.subr.bf16.mxu1 %v2007_v1 }
  0x27   :  { %380 = vmatpush1.bf16.msra.mxu0 %v2065_v7 }
  0x28   :  { %381 = vmatprep.subr.bf16.mxu0 %v2080_v11 }
  0x29   :  { %1649 = vmatpush3.bf16.msra.mxu1 %v2120_v18 }
  0x2a   :  { %1650 = vmatprep.subr.bf16.mxu1 %v2007_v1 }
  0x2b   :  { %382 = vmatpush1.bf16.msra.mxu0 %v2089_v13 }
  0x2c   :  { %383 = vmatprep.subr.bf16.mxu0 %v2095_v14 }
  0x2d   :  { %1651 = vmatpush3.bf16.msra.mxu1 %v2138_v21 }
  0x2e   :  { %1652 = vmatprep.subr.bf16.mxu1 %v2007_v1 }
  0x2f   :  { %384 = vmatpush1.bf16.msra.mxu0 %v2107_v16 }
  0x30   :  { %385 = vmatprep.subr.bf16.mxu0 %v2113_v17 }
  0x31   :  { %1653 = vmatpush3.bf16.msra.mxu1 %v2157_v24 }
  0x32   :  { %1654 = vmatprep.subr.bf16.mxu1 %v2007_v1 }
  0x33   :  { %386 = vmatpush1.bf16.msra.mxu0 %v2125_v19 }
  0x34   :  { %387 = vmatprep.subr.bf16.mxu0 %v2131_v20 }
  0x35   :  { %1655 = vmatpush3.bf16.msra.mxu1 %v2176_v27 }
  0x36   :  { %1656 = vmatprep.subr.bf16.mxu1 %v2007_v1 }
  0x37   :  { %388 = vmatpush1.bf16.msra.mxu0 %v2145_v22 }
  0x38   :  { %389 = vmatprep.subr.bf16.mxu0 %v2151_v23 }
  0x39   :  { %1657 = vmatpush3.bf16.msra.mxu1 %v2190_v29 }
  0x3a   :  { %1658 = vmatprep.subr.bf16.mxu1 %v2007_v1 }
  0x3b   :  { %390 = vmatpush1.bf16.msra.mxu0 %v2164_v25 }
  0x3c   :  { %391 = vmatprep.subr.bf16.mxu0 %v2170_v26 }
  0x3d   :  { %1659 = vmatpush3.bf16.msra.mxu1 %v2198_v30 }
  0x3e   :  { %1660 = vmatprep.subr.bf16.mxu1 %v2007_v1 }
  0x3f   :  { %392 = vmatpush1.bf16.msra.mxu0 %v2183_v28 }
  0x40   :  { %531 = vmatprep.subr.bf16.mxu0 %v2039_v0 }
  0x41   :  { %1661 = vmatpush3.bf16.msra.mxu1 %v2208_v32 }
  0x42   :  { %1666 = vmatprep.subr.bf16.mxu1 %v2007_v1 }
  0x94   :  { %v2248_v36 = vpop.xlane.xlu0 %63 }
  0x95   :  { %vm65_vm1 = vcmp.eq.f32.partialorder %v2073_v9, %v2248_v36 }
  0x96   :  { %v66_v37 = vsel %vm65_vm1, %v61_v34, -inf }
  0x97   :  { %67 = vmax.xlane.f32.xlu1 %v66_v37  ;;  %v308_v37 = vunpack.c.l.bf16 %v303_v31 }
  0x98   :  { %v2252_v39 = vpop.xlane.xlu0 %77 }
  0x99   :  { %vm79_vm2 = vcmp.eq.f32.partialorder %v2083_v12, %v2252_v39 }
  0x9a   :  { %v80_v40 = vsel %vm79_vm2, %v75_v38, -inf }
  0x9b   :  { %81 = vmax.xlane.f32.xlu1 %v80_v40 }
  0xf5   :  { %v252_v45 = vpop.f32.mrb[0].mxu0 }
  0xf6   :  { %v312_v47 = vadd.f32 %v306_v43, %v252_v45  ;;  %v254_v48 = vpop.f32.mrb[1].mxu0 }
  0xf7   :  { %v256_v49 = vpop.f32.mrb[2].mxu0  ;;  %v326_v54 = vadd.f32 %v307_v46, %v254_v48  ;;  %v295_v58 = vpop.f32.mrb[0].mxu1 }
  0xf8   :  { %v1487_v51 = vmul.f32 -1.442695, %v312_v47  ;;  %v313_v52 = vadd.f32 %v309_v44, %v256_v49  ;;  %v258_v53 = vpop.f32.mrb[3].mxu0  ;;  %v1644_v60 = vpop.f32.mrb[1].mxu1  ;;  %v346_v34 = vadd.f32 %v2265_v10, %v295_v58 }
  0xf9   :  { %v327_v56 = vadd.f32 %v310_v50, %v258_v53  ;;  %v1489_v57 = vmul.f32 -1.442695, %v326_v54  ;;  %v298_v61 = vpop.f32.mrb[2].mxu1 }
  0xfa   :  { %1822 = vpow2.f32 %v1487_v51  ;;  %v1488_v55 = vmul.f32 -1.442695, %v313_v52  ;;  %v1645_v62 = vpop.f32.mrb[3].mxu1  ;;  %v347_v38 = vadd.f32 %v2265_v10, %v298_v61  ;;  %v70_v51 = vcvt.f32.s32 %v2248_v36 }
  0xfb   :  { %v1490_v59 = vmul.f32 -1.442695, %v327_v56  ;;  %v84_v61 = vcvt.f32.s32 %v2252_v39  ;;  %v1492_v39 = vld [vmem:[%s2783_s0 + $0x18] sm:$0xff] }
  0xfc   :  { %1824 = vpow2.f32 %v1488_v55  ;;  %v71_v60 = vshll.u32 %v70_v51, 16 }
  0xfd   :  { %1826 = vpow2.f32 %v1489_v57 }
  0xfe   :  { %1828 = vpow2.f32 %v1490_v59 }
 0x104   :  { %v1823_v63 = vpop.eup %1822 }
 0x105   :  { %v320_v4 = vadd.f32 1.0, %v1823_v63 }
 0x106   :  { %v1825_v5 = vpop.eup %1824 }
 0x107   :  { %1830 = vrcp.f32 %v320_v4  ;;  %v321_v8 = vadd.f32 1.0, %v1825_v5  ;;  %v1827_v9 = vpop.eup %1826 }
 0x108   :  { %v1829_v12 = vpop.eup %1828  ;;  %v334_v33 = vadd.f32 1.0, %v1827_v9  ;;  %v85_v9 = vshll.u32 %v84_v61, 16 }
 0x109   :  { %1832 = vrcp.f32 %v321_v8  ;;  %v335_v35 = vadd.f32 1.0, %v1829_v12 }
 0x10a   :  { %1834 = vrcp.f32 %v334_v33 }
 0x10b   :  { %1836 = vrcp.f32 %v335_v35  ;;  %v466_v35 = vunpack.c.l.bf16 %v1492_v39 }
 0x111   :  { %v1831_v40 = vpop.eup %1830 }
 0x112   :  { %v348_v41 = vmul.f32 %v1831_v40, %v346_v34  ;;  %v1494_v34 = vld [vmem:[%s2783_s0 + $0x24] sm:$0xff] }
 0x113   :  { %v1833_v43 = vpop.eup %1832 }
 0x114   :  { %v350_v44 = vadd.f32 %v348_v41, %v308_v37  ;;  %v349_v45 = vmul.f32 %v1833_v43, %v347_v38  ;;  %v1835_v47 = vpop.eup %1834  ;;  %v467_v37 = vunpack.c.h.bf16 %v1492_v39  ;;  %v469_v38 = vunpack.c.l.bf16 %v1494_v34 }
 0x115   :  { %v1837_v48 = vpop.eup %1836  ;;  %v354_v49 = vsub.f32 1.0, %v1835_v47  ;;  %v358_v54 = vmul.f32 0.0, %v1835_v47 }
 0x116   :  { %1838 = vtanh.f32 %v350_v44  ;;  %v351_v46 = vadd.f32 %v349_v45, %v311_v42  ;;  %v355_v52 = vsub.f32 1.0, %v1837_v48  ;;  %v359_v58 = vmul.f32 0.0, %v1837_v48 }
 0x117   :  { %v470_v42 = vunpack.c.h.bf16 %v1494_v34 }
 0x118   :  { %1840 = vtanh.f32 %v351_v46 }
 0x120   :  { %v1839_v50 = vpop.eup %1838 }
 0x121   :  { %v356_v53 = vmul.f32 %v1839_v50, %v354_v49 }
 0x122   :  { %v1841_v55 = vpop.eup %1840 }
 0x123   :  { %v357_v57 = vmul.f32 %v1841_v55, %v355_v52  ;;  %v360_v59 = vadd.f32 %v358_v54, %v356_v53 }
 0x124   :  { %v68_v56 = vpop.xlane.xlu1 %67 }
 0x125   :  { %v69_v62 = vcvt.f32.s32 %v68_v56  ;;  %v361_v63 = vadd.f32 %v359_v58, %v357_v57 }
 0x127   :  { %v2274_v4 = vadd.s32 %v71_v60, %v69_v62  ;;  %v1549_v8 = vpack.c.bf16 %v361_v63, %v360_v59 }
 0x128   :  { %v82_v5 = vpop.xlane.xlu1 %81 }
 0x129   :  { %v83_v12 = vcvt.f32.s32 %v82_v5  ;;  %vm364_vm3 = vcmp.gt.s32.totalorder %v2274_v4, 0  ;;  %vm518_vm6 = vcmp.gt.s32.totalorder %v2274_v4, 1  ;;  %vm672_vm8 = vcmp.gt.s32.totalorder %v2274_v4, 2 }
 0x12a   :  { %v2277_v36 = vsel %vm364_vm3, %v360_v59, 0.0  ;;  %vm826_vm10 = vcmp.gt.s32.totalorder %v2274_v4, 3  ;;  %vm980_vm12 = vcmp.gt.s32.totalorder %v2274_v4, 4  ;;  %vm1134_vm14 = vcmp.gt.s32.totalorder %v2274_v4, 5 }
 0x12b   :  { %v2279_v31 = vadd.s32 %v85_v9, %v83_v12  ;;  %vm1442_vm2 = vcmp.gt.s32.totalorder %v2274_v4, 7 }
 0x12d   :  { %vm365_vm4 = vcmp.gt.s32.totalorder %v2279_v31, 0  ;;  %vm519_vm7 = vcmp.gt.s32.totalorder %v2279_v31, 1  ;;  %vm673_vm9 = vcmp.gt.s32.totalorder %v2279_v31, 2  ;;  %vm827_vm11 = vcmp.gt.s32.totalorder %v2279_v31, 3 }
 0x12e   :  { %v2282_v33 = vsel %vm365_vm4, %v361_v63, 0.0  ;;  %vm1548_vm5 = vmpackc.low %vm365_vm4, %vm364_vm3  ;;  %vm981_vm13 = vcmp.gt.s32.totalorder %v2279_v31, 4  ;;  %vm1135_vm15 = vcmp.gt.s32.totalorder %v2279_v31, 5  ;;  %vm1289_vm1 = vcmp.gt.s32.totalorder %v2279_v31, 6 }
 0x12f   :  { %1550 = vmatmul.mubr.msk.bf16.vlgmr.msra.gmra.mrb[4].mxu0 %vm1548_vm5, %v1549_v8  ;;  %1663 = vmatmul.mubr.msk.bf16.vlgmr.msra.gmra.mrb[4].mxu1 %vm1548_vm5, %v1549_v8  ;;  %v1493_v8 = vld [vmem:[%s2783_s0 + $0x20] ss:$12 sps:$4 sm:$0xff]   ;;  %vm1443_vm3 = vcmp.gt.s32.totalorder %v2279_v31, 7 }
 0x130   :  { %532 = vmatpush1.bf16.msra.mxu0 %v2046_v3  ;;  %1667 = vmatpush3.bf16.msra.mxu1 %v2101_v15  ;;  %v468_v9 = vunpack.c.l.bf16 %v1493_v8 }
 0x131   :  { %533 = vmatprep.subr.bf16.mxu0 %v2060_v6  ;;  %1668 = vmatprep.subr.bf16.mxu1 %v2007_v1 }
 0x132   :  { %563 = vmatprep.mubr.bf16.mxu0 %v2008_v2  ;;  %1682 = vmatprep.mubr.msk.bf16.mxu1 %vm2009_vm0, %v2007_v1 }
 0x134   :  { %534 = vmatpush1.bf16.msra.mxu0 %v2065_v7  ;;  %1669 = vmatpush3.bf16.msra.mxu1 %v2120_v18 }
 0x135   :  { %535 = vmatprep.subr.bf16.mxu0 %v2080_v11  ;;  %1670 = vmatprep.subr.bf16.mxu1 %v2007_v1 }
 0x138   :  { %536 = vmatpush1.bf16.msra.mxu0 %v2089_v13  ;;  %1671 = vmatpush3.bf16.msra.mxu1 %v2138_v21 }
 0x139   :  { %537 = vmatprep.subr.bf16.mxu0 %v2095_v14  ;;  %1672 = vmatprep.subr.bf16.mxu1 %v2007_v1 }
 0x13c   :  { %538 = vmatpush1.bf16.msra.mxu0 %v2107_v16  ;;  %1673 = vmatpush3.bf16.msra.mxu1 %v2157_v24 }
 0x13d   :  { %539 = vmatprep.subr.bf16.mxu0 %v2113_v17  ;;  %1674 = vmatprep.subr.bf16.mxu1 %v2007_v1 }
 0x140   :  { %540 = vmatpush1.bf16.msra.mxu0 %v2125_v19  ;;  %1675 = vmatpush3.bf16.msra.mxu1 %v2176_v27 }
 0x141   :  { %541 = vmatprep.subr.bf16.mxu0 %v2131_v20  ;;  %1676 = vmatprep.subr.bf16.mxu1 %v2007_v1 }
 0x144   :  { %542 = vmatpush1.bf16.msra.mxu0 %v2145_v22  ;;  %1677 = vmatpush3.bf16.msra.mxu1 %v2190_v29 }
 0x145   :  { %543 = vmatprep.subr.bf16.mxu0 %v2151_v23  ;;  %1678 = vmatprep.subr.bf16.mxu1 %v2007_v1 }
 0x148   :  { %544 = vmatpush1.bf16.msra.mxu0 %v2164_v25  ;;  %1679 = vmatpush3.bf16.msra.mxu1 %v2198_v30 }
 0x149   :  { %545 = vmatprep.subr.bf16.mxu0 %v2170_v26  ;;  %1680 = vmatprep.subr.bf16.mxu1 %v2007_v1 }
 0x14c   :  { %546 = vmatpush1.bf16.msra.mxu0 %v2183_v28  ;;  %1681 = vmatpush3.bf16.msra.mxu1 %v2208_v32 }
 0x14d   :  { %685 = vmatprep.subr.bf16.mxu0 %v2039_v0  ;;  %1686 = vmatprep.subr.bf16.mxu1 %v2007_v1 }
 0x202   :  { %v411_v40 = vpop.f32.mrb[4].mxu0  ;;  %v454_v41 = vpop.f32.mrb[4].mxu1 }
 0x203   :  { %v472_v43 = vadd.f32 %v466_v35, %v411_v40  ;;  %v413_v44 = vpop.f32.mrb[5].mxu0  ;;  %v1664_v45 = vpop.f32.mrb[5].mxu1  ;;  %v500_v12 = vadd.f32 %v2265_v10, %v454_v41 }
 0x204   :  { %v486_v46 = vadd.f32 %v467_v37, %v413_v44  ;;  %v415_v47 = vpop.f32.mrb[6].mxu0  ;;  %v457_v48 = vpop.f32.mrb[6].mxu1  ;;  %v471_v37 = vunpack.c.h.bf16 %v1493_v8 }
 0x205   :  { %v1496_v49 = vmul.f32 -1.442695, %v472_v43  ;;  %v473_v50 = vadd.f32 %v469_v38, %v415_v47  ;;  %v417_v51 = vpop.f32.mrb[7].mxu0  ;;  %v1665_v52 = vpop.f32.mrb[7].mxu1  ;;  %v501_v38 = vadd.f32 %v2265_v10, %v457_v48 }
 0x206   :  { %v1498_v53 = vmul.f32 -1.442695, %v486_v46  ;;  %v487_v54 = vadd.f32 %v470_v42, %v417_v51 }
 0x207   :  { %1842 = vpow2.f32 %v1496_v49  ;;  %v1497_v55 = vmul.f32 -1.442695, %v473_v50 }
 0x208   :  { %1844 = vpow2.f32 %v1498_v53  ;;  %v1499_v56 = vmul.f32 -1.442695, %v487_v54 }
 0x209   :  { %1846 = vpow2.f32 %v1497_v55 }
 0x20a   :  { %1848 = vpow2.f32 %v1499_v56 }
 0x211   :  { %v1843_v57 = vpop.eup %1842 }
 0x212   :  { %v1845_v58 = vpop.eup %1844  ;;  %v480_v59 = vadd.f32 1.0, %v1843_v57 }
 0x213   :  { %v1847_v60 = vpop.eup %1846  ;;  %v494_v61 = vadd.f32 1.0, %v1845_v58 }
 0x214   :  { %v1849_v62 = vpop.eup %1848  ;;  %1850 = vrcp.f32 %v480_v59  ;;  %v481_v63 = vadd.f32 1.0, %v1847_v60 }
 0x215   :  { %1852 = vrcp.f32 %v494_v61  ;;  %v495_v5 = vadd.f32 1.0, %v1849_v62 }
 0x216   :  { %1854 = vrcp.f32 %v481_v63 }
 0x217   :  { %1856 = vrcp.f32 %v495_v5 }
 0x21e   :  { %v1851_v39 = vpop.eup %1850 }
 0x21f   :  { %v1853_v34 = vpop.eup %1852  ;;  %v502_v35 = vmul.f32 %v1851_v39, %v500_v12 }
 0x220   :  { %v1855_v40 = vpop.eup %1854  ;;  %v512_v42 = vmul.f32 %v1853_v34, %v2277_v36  ;;  %v508_v49 = vsub.f32 1.0, %v1853_v34 }
 0x221   :  { %v1857_v43 = vpop.eup %1856  ;;  %v504_v44 = vadd.f32 %v502_v35, %v468_v9  ;;  %v503_v45 = vmul.f32 %v1855_v40, %v501_v38 }
 0x222   :  { %v513_v46 = vmul.f32 %v1857_v43, %v2282_v33  ;;  %v509_v41 = vsub.f32 1.0, %v1857_v43 }
 0x223   :  { %1858 = vtanh.f32 %v504_v44  ;;  %v505_v47 = vadd.f32 %v503_v45, %v471_v37 }
 0x225   :  { %1860 = vtanh.f32 %v505_v47 }
 0x22d   :  { %v1859_v50 = vpop.eup %1858 }
 0x22e   :  { %v510_v51 = vmul.f32 %v1859_v50, %v508_v49 }
 0x22f   :  { %v1861_v52 = vpop.eup %1860 }
 0x230   :  { %v511_v53 = vmul.f32 %v1861_v52, %v509_v41  ;;  %v514_v54 = vadd.f32 %v512_v42, %v510_v51  ;;  %v1501_v52 = vld [vmem:[%s2783_s0 + $0x38] ss:$12 sps:$4 sm:$0xff]  }
 0x232   :  { %v515_v48 = vadd.f32 %v513_v46, %v511_v53  ;;  %v2334_v55 = vsel %vm518_vm6, %v514_v54, %v2277_v36  ;;  %v1500_v36 = vld [vmem:[%s2783_s0 + $0x30] sm:$0xff]  ;;  %v622_v54 = vunpack.c.l.bf16 %v1501_v52 }
 0x233   :  { %v620_v58 = vunpack.c.l.bf16 %v1500_v36  ;;  %v621_v62 = vunpack.c.h.bf16 %v1500_v36 }
 0x234   :  { %v2338_v56 = vsel %vm519_vm7, %v515_v48, %v2282_v33  ;;  %v1502_v33 = vld [vmem:[%s2783_s0 + $0x3c] sm:$0xff] }
 0x235   :  { %v530_v57 = vpack.c.bf16 %v2338_v56, %v2334_v55  ;;  %v623_v59 = vunpack.c.l.bf16 %v1502_v33  ;;  %v624_v39 = vunpack.c.h.bf16 %v1502_v33 }
 0x237   :  { %564 = vmatmul.mubr.bf16.vlgmr.msra.gmra.mrb[8].mxu0 %v530_v57  ;;  %1683 = vmatmul.mubr.bf16.vlgmr.msra.gmra.mrb[8].mxu1 %v530_v57 }
 0x238   :  { %686 = vmatpush1.bf16.msra.mxu0 %v2046_v3  ;;  %1687 = vmatpush3.bf16.msra.mxu1 %v2101_v15 }
 0x239   :  { %687 = vmatprep.subr.bf16.mxu0 %v2060_v6  ;;  %1688 = vmatprep.subr.bf16.mxu1 %v2007_v1 }
 0x23a   :  { %717 = vmatprep.mubr.bf16.mxu0 %v2008_v2  ;;  %1702 = vmatprep.mubr.msk.bf16.mxu1 %vm2009_vm0, %v2007_v1 }
 0x23c   :  { %688 = vmatpush1.bf16.msra.mxu0 %v2065_v7  ;;  %1689 = vmatpush3.bf16.msra.mxu1 %v2120_v18 }
 0x23d   :  { %689 = vmatprep.subr.bf16.mxu0 %v2080_v11  ;;  %1690 = vmatprep.subr.bf16.mxu1 %v2007_v1 }
 0x240   :  { %690 = vmatpush1.bf16.msra.mxu0 %v2089_v13  ;;  %1691 = vmatpush3.bf16.msra.mxu1 %v2138_v21 }
 0x241   :  { %691 = vmatprep.subr.bf16.mxu0 %v2095_v14  ;;  %1692 = vmatprep.subr.bf16.mxu1 %v2007_v1 }
 0x244   :  { %692 = vmatpush1.bf16.msra.mxu0 %v2107_v16  ;;  %1693 = vmatpush3.bf16.msra.mxu1 %v2157_v24 }
 0x245   :  { %693 = vmatprep.subr.bf16.mxu0 %v2113_v17  ;;  %1694 = vmatprep.subr.bf16.mxu1 %v2007_v1 }
 0x248   :  { %694 = vmatpush1.bf16.msra.mxu0 %v2125_v19  ;;  %1695 = vmatpush3.bf16.msra.mxu1 %v2176_v27 }
 0x249   :  { %695 = vmatprep.subr.bf16.mxu0 %v2131_v20  ;;  %1696 = vmatprep.subr.bf16.mxu1 %v2007_v1 }
 0x24c   :  { %696 = vmatpush1.bf16.msra.mxu0 %v2145_v22  ;;  %1697 = vmatpush3.bf16.msra.mxu1 %v2190_v29 }
 0x24d   :  { %697 = vmatprep.subr.bf16.mxu0 %v2151_v23  ;;  %1698 = vmatprep.subr.bf16.mxu1 %v2007_v1 }
 0x250   :  { %698 = vmatpush1.bf16.msra.mxu0 %v2164_v25  ;;  %1699 = vmatpush3.bf16.msra.mxu1 %v2198_v30 }
 0x251   :  { %699 = vmatprep.subr.bf16.mxu0 %v2170_v26  ;;  %1700 = vmatprep.subr.bf16.mxu1 %v2007_v1 }
 0x254   :  { %700 = vmatpush1.bf16.msra.mxu0 %v2183_v28  ;;  %1701 = vmatpush3.bf16.msra.mxu1 %v2208_v32 }
 0x255   :  { %839 = vmatprep.subr.bf16.mxu0 %v2039_v0  ;;  %1706 = vmatprep.subr.bf16.mxu1 %v2007_v1 }
 0x30a   :  { %v565_v60 = vpop.f32.mrb[8].mxu0  ;;  %v608_v61 = vpop.f32.mrb[8].mxu1 }
 0x30b   :  { %v626_v63 = vadd.f32 %v620_v58, %v565_v60  ;;  %v567_v5 = vpop.f32.mrb[9].mxu0  ;;  %v1684_v8 = vpop.f32.mrb[9].mxu1  ;;  %v654_v48 = vadd.f32 %v2265_v10, %v608_v61  ;;  %v625_v58 = vunpack.c.h.bf16 %v1501_v52 }
 0x30c   :  { %v569_v9 = vpop.f32.mrb[10].mxu0  ;;  %v611_v12 = vpop.f32.mrb[10].mxu1  ;;  %v640_v40 = vadd.f32 %v621_v62, %v567_v5 }
 0x30d   :  { %v1504_v34 = vmul.f32 -1.442695, %v626_v63  ;;  %v627_v35 = vadd.f32 %v623_v59, %v569_v9  ;;  %v571_v37 = vpop.f32.mrb[11].mxu0  ;;  %v1685_v38 = vpop.f32.mrb[11].mxu1  ;;  %v655_v59 = vadd.f32 %v2265_v10, %v611_v12 }
 0x30e   :  { %v641_v43 = vadd.f32 %v624_v39, %v571_v37  ;;  %v1506_v44 = vmul.f32 -1.442695, %v640_v40 }
 0x30f   :  { %1862 = vpow2.f32 %v1504_v34  ;;  %v1505_v42 = vmul.f32 -1.442695, %v627_v35 }
 0x310   :  { %v1507_v45 = vmul.f32 -1.442695, %v641_v43 }
 0x311   :  { %1864 = vpow2.f32 %v1505_v42 }
 0x312   :  { %1866 = vpow2.f32 %v1506_v44 }
 0x313   :  { %1868 = vpow2.f32 %v1507_v45 }
 0x319   :  { %v1863_v46 = vpop.eup %1862 }
 0x31a   :  { %v634_v47 = vadd.f32 1.0, %v1863_v46 }
 0x31b   :  { %v1865_v49 = vpop.eup %1864 }
 0x31c   :  { %1870 = vrcp.f32 %v634_v47  ;;  %v635_v50 = vadd.f32 1.0, %v1865_v49  ;;  %v1867_v41 = vpop.eup %1866 }
 0x31d   :  { %v1869_v51 = vpop.eup %1868  ;;  %v648_v53 = vadd.f32 1.0, %v1867_v41 }
 0x31e   :  { %1872 = vrcp.f32 %v635_v50  ;;  %v649_v57 = vadd.f32 1.0, %v1869_v51 }
 0x31f   :  { %1874 = vrcp.f32 %v648_v53 }
 0x320   :  { %1876 = vrcp.f32 %v649_v57 }
 0x326   :  { %v1871_v36 = vpop.eup %1870 }
 0x327   :  { %v656_v33 = vmul.f32 %v1871_v36, %v654_v48 }
 0x328   :  { %v1873_v60 = vpop.eup %1872 }
 0x329   :  { %v658_v62 = vadd.f32 %v656_v33, %v622_v54  ;;  %v657_v63 = vmul.f32 %v1873_v60, %v655_v59  ;;  %v1875_v8 = vpop.eup %1874 }
 0x32a   :  { %v1877_v9 = vpop.eup %1876  ;;  %v662_v39 = vsub.f32 1.0, %v1875_v8  ;;  %v666_v61 = vmul.f32 %v1875_v8, %v2334_v55 }
 0x32b   :  { %1878 = vtanh.f32 %v658_v62  ;;  %v659_v5 = vadd.f32 %v657_v63, %v625_v58  ;;  %v663_v35 = vsub.f32 1.0, %v1877_v9  ;;  %v667_v40 = vmul.f32 %v1877_v9, %v2338_v56 }
 0x32d   :  { %1880 = vtanh.f32 %v659_v5  ;;  %v1509_v5 = vld [vmem:[%s2783_s0 + $0x50] ss:$12 sps:$4 sm:$0xff]  }
 0x32e   :  { %v776_v9 = vunpack.c.l.bf16 %v1509_v5 }
 0x335   :  { %v1879_v34 = vpop.eup %1878 }
 0x336   :  { %v664_v37 = vmul.f32 %v1879_v34, %v662_v39 }
 0x337   :  { %v1881_v38 = vpop.eup %1880 }
 0x338   :  { %v665_v42 = vmul.f32 %v1881_v38, %v663_v35  ;;  %v668_v12 = vadd.f32 %v666_v61, %v664_v37  ;;  %v779_v37 = vunpack.c.h.bf16 %v1509_v5 }
 0x33a   :  { %v669_v43 = vadd.f32 %v667_v40, %v665_v42  ;;  %v2392_v44 = vsel %vm672_vm8, %v668_v12, %v2334_v55 }
 0x33c   :  { %v2396_v45 = vsel %vm673_vm9, %v669_v43, %v2338_v56 }
 0x33d   :  { %v684_v46 = vpack.c.bf16 %v2396_v45, %v2392_v44 }
 0x33f   :  { %718 = vmatmul.mubr.bf16.vlgmr.msra.gmra.mrb[12].mxu0 %v684_v46  ;;  %1703 = vmatmul.mubr.bf16.vlgmr.msra.gmra.mrb[12].mxu1 %v684_v46 }
 0x340   :  { %840 = vmatpush1.bf16.msra.mxu0 %v2046_v3  ;;  %1707 = vmatpush3.bf16.msra.mxu1 %v2101_v15  ;;  %v1508_v3 = vld [vmem:[%s2783_s0 + $0x48] sm:$0xff] }
 0x341   :  { %841 = vmatprep.subr.bf16.mxu0 %v2060_v6  ;;  %1708 = vmatprep.subr.bf16.mxu1 %v2007_v1  ;;  %v1510_v6 = vld [vmem:[%s2783_s0 + $0x54] sm:$0xff] }
 0x342   :  { %871 = vmatprep.mubr.bf16.mxu0 %v2008_v2  ;;  %1722 = vmatprep.mubr.msk.bf16.mxu1 %vm2009_vm0, %v2007_v1  ;;  %v778_v49 = vunpack.c.h.bf16 %v1510_v6 }
 0x344   :  { %842 = vmatpush1.bf16.msra.mxu0 %v2065_v7  ;;  %1709 = vmatpush3.bf16.msra.mxu1 %v2120_v18  ;;  %v774_v7 = vunpack.c.l.bf16 %v1508_v3 }
 0x345   :  { %843 = vmatprep.subr.bf16.mxu0 %v2080_v11  ;;  %1710 = vmatprep.subr.bf16.mxu1 %v2007_v1  ;;  %v777_v11 = vunpack.c.l.bf16 %v1510_v6 }
 0x348   :  { %844 = vmatpush1.bf16.msra.mxu0 %v2089_v13  ;;  %1711 = vmatpush3.bf16.msra.mxu1 %v2138_v21 }
 0x349   :  { %845 = vmatprep.subr.bf16.mxu0 %v2095_v14  ;;  %1712 = vmatprep.subr.bf16.mxu1 %v2007_v1 }
 0x34c   :  { %846 = vmatpush1.bf16.msra.mxu0 %v2107_v16  ;;  %1713 = vmatpush3.bf16.msra.mxu1 %v2157_v24  ;;  %v775_v16 = vunpack.c.h.bf16 %v1508_v3 }
 0x34d   :  { %847 = vmatprep.subr.bf16.mxu0 %v2113_v17  ;;  %1714 = vmatprep.subr.bf16.mxu1 %v2007_v1 }
 0x350   :  { %848 = vmatpush1.bf16.msra.mxu0 %v2125_v19  ;;  %1715 = vmatpush3.bf16.msra.mxu1 %v2176_v27 }
 0x351   :  { %849 = vmatprep.subr.bf16.mxu0 %v2131_v20  ;;  %1716 = vmatprep.subr.bf16.mxu1 %v2007_v1 }
 0x354   :  { %850 = vmatpush1.bf16.msra.mxu0 %v2145_v22  ;;  %1717 = vmatpush3.bf16.msra.mxu1 %v2190_v29 }
 0x355   :  { %851 = vmatprep.subr.bf16.mxu0 %v2151_v23  ;;  %1718 = vmatprep.subr.bf16.mxu1 %v2007_v1 }
 0x358   :  { %852 = vmatpush1.bf16.msra.mxu0 %v2164_v25  ;;  %1719 = vmatpush3.bf16.msra.mxu1 %v2198_v30 }
 0x359   :  { %853 = vmatprep.subr.bf16.mxu0 %v2170_v26  ;;  %1720 = vmatprep.subr.bf16.mxu1 %v2007_v1 }
 0x35c   :  { %854 = vmatpush1.bf16.msra.mxu0 %v2183_v28  ;;  %1721 = vmatpush3.bf16.msra.mxu1 %v2208_v32 }
 0x35d   :  { %993 = vmatprep.subr.bf16.mxu0 %v2039_v0  ;;  %1726 = vmatprep.subr.bf16.mxu1 %v2007_v1 }
 0x412   :  { %v719_v13 = vpop.f32.mrb[12].mxu0  ;;  %v762_v14 = vpop.f32.mrb[12].mxu1 }
 0x413   :  { %v780_v17 = vadd.f32 %v774_v7, %v719_v13  ;;  %v721_v55 = vpop.f32.mrb[13].mxu0  ;;  %v1704_v56 = vpop.f32.mrb[13].mxu1  ;;  %v808_v39 = vadd.f32 %v2265_v10, %v762_v14 }
 0x414   :  { %v723_v47 = vpop.f32.mrb[14].mxu0  ;;  %v765_v0 = vpop.f32.mrb[14].mxu1  ;;  %v794_v53 = vadd.f32 %v775_v16, %v721_v55 }
 0x415   :  { %v1512_v50 = vmul.f32 -1.442695, %v780_v17  ;;  %v781_v41 = vadd.f32 %v777_v11, %v723_v47  ;;  %v725_v51 = vpop.f32.mrb[15].mxu0  ;;  %v1705_v52 = vpop.f32.mrb[15].mxu1  ;;  %v809_v38 = vadd.f32 %v2265_v10, %v765_v0 }
 0x416   :  { %v795_v48 = vadd.f32 %v778_v49, %v725_v51  ;;  %v1514_v57 = vmul.f32 -1.442695, %v794_v53  ;;  %v2492_v51 = vld [vmem:[%s2781_s1 + $0x30] ss:$12 sps:$4 sm:$0xff]   ;;  %v2506_v52 = vld [vmem:[%s2781_s1 + $0x48] ss:$12 sps:$4 sm:$0xff]  }
 0x417   :  { %1882 = vpow2.f32 %v1512_v50  ;;  %v1513_v54 = vmul.f32 -1.442695, %v781_v41  ;;  %v2461_v41 = vld [vmem:[%s2781_s1] ss:$12 sps:$4 sm:$0xff]  }
 0x418   :  { %v1515_v36 = vmul.f32 -1.442695, %v795_v48 }
 0x419   :  { %1884 = vpow2.f32 %v1513_v54 }
 0x41a   :  { %1886 = vpow2.f32 %v1514_v57 }
 0x41b   :  { %1888 = vpow2.f32 %v1515_v36 }
 0x421   :  { %v1883_v33 = vpop.eup %1882 }
 0x422   :  { %v788_v58 = vadd.f32 1.0, %v1883_v33 }
 0x423   :  { %v1885_v59 = vpop.eup %1884 }
 0x424   :  { %1890 = vrcp.f32 %v788_v58  ;;  %v789_v60 = vadd.f32 1.0, %v1885_v59  ;;  %v1887_v62 = vpop.eup %1886 }
 0x425   :  { %v1889_v63 = vpop.eup %1888  ;;  %v802_v8 = vadd.f32 1.0, %v1887_v62 }
 0x426   :  { %1892 = vrcp.f32 %v789_v60  ;;  %v803_v34 = vadd.f32 1.0, %v1889_v63 }
 0x427   :  { %1894 = vrcp.f32 %v802_v8 }
 0x428   :  { %1896 = vrcp.f32 %v803_v34 }
 0x42e   :  { %v1891_v61 = vpop.eup %1890 }
 0x42f   :  { %v810_v35 = vmul.f32 %v1891_v61, %v808_v39 }
 0x430   :  { %v1893_v40 = vpop.eup %1892 }
 0x431   :  { %v812_v42 = vadd.f32 %v810_v35, %v776_v9  ;;  %v811_v12 = vmul.f32 %v1893_v40, %v809_v38  ;;  %v1895_v46 = vpop.eup %1894  ;;  %v1517_v35 = vld [vmem:[%s2783_s0 + $0x68] ss:$12 sps:$4 sm:$0xff]  }
 0x432   :  { %v1897_v3 = vpop.eup %1896  ;;  %v816_v6 = vsub.f32 1.0, %v1895_v46  ;;  %v820_v11 = vmul.f32 %v1895_v46, %v2392_v44  ;;  %v930_v38 = vunpack.c.l.bf16 %v1517_v35  ;;  %v933_v46 = vunpack.c.h.bf16 %v1517_v35 }
 0x433   :  { %1898 = vtanh.f32 %v812_v42  ;;  %v813_v43 = vadd.f32 %v811_v12, %v779_v37  ;;  %v817_v13 = vsub.f32 1.0, %v1897_v3  ;;  %v821_v17 = vmul.f32 %v1897_v3, %v2396_v45 }
 0x435   :  { %1900 = vtanh.f32 %v813_v43 }
 0x43d   :  { %v1899_v7 = vpop.eup %1898 }
 0x43e   :  { %v818_v14 = vmul.f32 %v1899_v7, %v816_v6 }
 0x43f   :  { %v1901_v16 = vpop.eup %1900 }
 0x440   :  { %v819_v55 = vmul.f32 %v1901_v16, %v817_v13  ;;  %v822_v56 = vadd.f32 %v820_v11, %v818_v14 }
 0x442   :  { %v823_v47 = vadd.f32 %v821_v17, %v819_v55  ;;  %v2450_v0 = vsel %vm826_vm10, %v822_v56, %v2392_v44  ;;  %v2468_v44 = vld [vmem:[%s2781_s1 + $0x1c] ss:$12 sps:$4 sm:$0xff]  }
 0x444   :  { %v2454_v49 = vsel %vm827_vm11, %v823_v47, %v2396_v45  ;;  %v2478_v45 = vld [vmem:[%s2781_s1 + $0x18] ss:$12 sps:$4 sm:$0xff]  }
 0x445   :  { %v838_v50 = vpack.c.bf16 %v2454_v49, %v2450_v0 }
 0x447   :  { %872 = vmatmul.mubr.bf16.vlgmr.msra.gmra.mrb[16].mxu0 %v838_v50  ;;  %1723 = vmatmul.mubr.bf16.vlgmr.msra.gmra.mrb[16].mxu1 %v838_v50 }
 0x448   :  { %994 = vmatpush1.bf16.msra.mxu0 %v2461_v41  ;;  %1727 = vmatpush3.bf16.msra.mxu1 %v2101_v15  ;;  %v2485_v15 = vld [vmem:[%s2781_s1 + $0x34] ss:$12 sps:$4 sm:$0xff]  }
 0x449   :  { %995 = vmatprep.subr.bf16.mxu0 %v2468_v44  ;;  %1728 = vmatprep.subr.bf16.mxu1 %v2007_v1 }
 0x44a   :  { %1025 = vmatprep.mubr.bf16.mxu0 %v2008_v2  ;;  %1742 = vmatprep.mubr.msk.bf16.mxu1 %vm2009_vm0, %v2007_v1 }
 0x44c   :  { %996 = vmatpush1.bf16.msra.mxu0 %v2478_v45  ;;  %1729 = vmatpush3.bf16.msra.mxu1 %v2120_v18  ;;  %v2499_v18 = vld [vmem:[%s2781_s1 + $0x4c] ss:$12 sps:$4 sm:$0xff]  }
 0x44d   :  { %997 = vmatprep.subr.bf16.mxu0 %v2485_v15  ;;  %1730 = vmatprep.subr.bf16.mxu1 %v2007_v1 }
 0x450   :  { %998 = vmatpush1.bf16.msra.mxu0 %v2492_v51  ;;  %1731 = vmatpush3.bf16.msra.mxu1 %v2138_v21  ;;  %v2513_v21 = vld [vmem:[%s2781_s1 + $0x64] ss:$12 sps:$4 sm:$0xff]  }
 0x451   :  { %999 = vmatprep.subr.bf16.mxu0 %v2499_v18  ;;  %1732 = vmatprep.subr.bf16.mxu1 %v2007_v1 }
 0x454   :  { %1000 = vmatpush1.bf16.msra.mxu0 %v2506_v52  ;;  %1733 = vmatpush3.bf16.msra.mxu1 %v2157_v24 }
 0x455   :  { %1001 = vmatprep.subr.bf16.mxu0 %v2513_v21  ;;  %1734 = vmatprep.subr.bf16.mxu1 %v2007_v1 }
 0x458   :  { %1002 = vmatpush1.bf16.msra.mxu0 %v2125_v19  ;;  %1735 = vmatpush3.bf16.msra.mxu1 %v2176_v27  ;;  %v2534_v19 = vld [vmem:[%s2781_s1 + $0x4] ss:$12 sps:$4 sm:$0xff]  }
 0x459   :  { %1003 = vmatprep.subr.bf16.mxu0 %v2131_v20  ;;  %1736 = vmatprep.subr.bf16.mxu1 %v2007_v1  ;;  %v1516_v20 = vld [vmem:[%s2783_s0 + $0x60] sm:$0xff] }
 0x45a   :  { %v929_v27 = vunpack.c.h.bf16 %v1516_v20 }
 0x45c   :  { %1004 = vmatpush1.bf16.msra.mxu0 %v2145_v22  ;;  %1737 = vmatpush3.bf16.msra.mxu1 %v2190_v29  ;;  %v1518_v22 = vld [vmem:[%s2783_s0 + $0x6c] sm:$0xff] }
 0x45d   :  { %1005 = vmatprep.subr.bf16.mxu0 %v2151_v23  ;;  %1738 = vmatprep.subr.bf16.mxu1 %v2007_v1  ;;  %v928_v23 = vunpack.c.l.bf16 %v1516_v20  ;;  %v931_v24 = vunpack.c.l.bf16 %v1518_v22  ;;  %v932_v54 = vunpack.c.h.bf16 %v1518_v22 }
 0x460   :  { %1006 = vmatpush1.bf16.msra.mxu0 %v2164_v25  ;;  %1739 = vmatpush3.bf16.msra.mxu1 %v2198_v30 }
 0x461   :  { %1007 = vmatprep.subr.bf16.mxu0 %v2170_v26  ;;  %1740 = vmatprep.subr.bf16.mxu1 %v2007_v1 }
 0x464   :  { %1008 = vmatpush1.bf16.msra.mxu0 %v2183_v28  ;;  %1741 = vmatpush3.bf16.msra.mxu1 %v2208_v32 }
 0x465   :  { %1147 = vmatprep.subr.bf16.mxu0 %v2534_v19  ;;  %1746 = vmatprep.subr.bf16.mxu1 %v2007_v1 }
 0x51a   :  { %v873_v25 = vpop.f32.mrb[16].mxu0  ;;  %v916_v26 = vpop.f32.mrb[16].mxu1 }
 0x51b   :  { %v934_v28 = vadd.f32 %v928_v23, %v873_v25  ;;  %v875_v29 = vpop.f32.mrb[17].mxu0  ;;  %v1724_v30 = vpop.f32.mrb[17].mxu1  ;;  %v962_v40 = vadd.f32 %v2265_v10, %v916_v26 }
 0x51c   :  { %v877_v32 = vpop.f32.mrb[18].mxu0  ;;  %v919_v53 = vpop.f32.mrb[18].mxu1  ;;  %v948_v58 = vadd.f32 %v929_v27, %v875_v29  ;;  %v2595_v29 = vld [vmem:[%s2781_s1 + $0x50] ss:$12 sps:$4 sm:$0xff]   ;;  %v2603_v30 = vld [vmem:[%s2781_s1 + $0x60] ss:$12 sps:$4 sm:$0xff]  }
 0x51d   :  { %v1520_v48 = vmul.f32 -1.442695, %v934_v28  ;;  %v935_v57 = vadd.f32 %v931_v24, %v877_v32  ;;  %v879_v36 = vpop.f32.mrb[19].mxu0  ;;  %v1725_v33 = vpop.f32.mrb[19].mxu1  ;;  %v963_v3 = vadd.f32 %v2265_v10, %v919_v53  ;;  %v2565_v28 = vld [vmem:[%s2781_s1 + $0x8] ss:$12 sps:$4 sm:$0xff]  }
 0x51e   :  { %v949_v60 = vadd.f32 %v932_v54, %v879_v36  ;;  %v1522_v62 = vmul.f32 -1.442695, %v948_v58  ;;  %v2609_v32 = vld [vmem:[%s2781_s1 + $0x68] ss:$12 sps:$4 sm:$0xff]   ;;  %v2622_v54 = vld [vmem:[%s2781_s1 + $0x78] ss:$12 sps:$4 sm:$0xff]  }
 0x51f   :  { %1902 = vpow2.f32 %v1520_v48  ;;  %v1521_v59 = vmul.f32 -1.442695, %v935_v57  ;;  %v2615_v53 = vld [vmem:[%s2781_s1 + $0x7c] ss:$12 sps:$4 sm:$0xff]   ;;  %v2628_v48 = vld [vmem:[%s2781_s1 + $0x80] ss:$12 sps:$4 sm:$0xff]  }
 0x520   :  { %v1523_v63 = vmul.f32 -1.442695, %v949_v60  ;;  %v2634_v57 = vld [vmem:[%s2781_s1 + $0x94] ss:$12 sps:$4 sm:$0xff]   ;;  %v2641_v36 = vld [vmem:[%s2781_s1 + $0x90] ss:$12 sps:$4 sm:$0xff]  }
 0x521   :  { %1904 = vpow2.f32 %v1521_v59  ;;  %v2647_v33 = vld [vmem:[%s2781_s1 + $0x98] ss:$12 sps:$4 sm:$0xff]   ;;  %v2660_v59 = vld [vmem:[%s2781_s1 + $0xa8] ss:$12 sps:$4 sm:$0xff]   ;;  %v2666_v60 = vld [vmem:[%s2781_s1 + $0xb0] ss:$12 sps:$4 sm:$0xff]  }
 0x522   :  { %1906 = vpow2.f32 %v1522_v62  ;;  %v2653_v58 = vld [vmem:[%s2781_s1 + $0xac] ss:$12 sps:$4 sm:$0xff]  }
 0x523   :  { %1908 = vpow2.f32 %v1523_v63  ;;  %v1524_v62 = vld [vmem:[%s2783_s0 + $0x78] sm:$0xff]  ;;  %v1526_v63 = vld [vmem:[%s2783_s0 + $0x84] sm:$0xff] }
 0x529   :  { %v1903_v5 = vpop.eup %1902 }
 0x52a   :  { %v942_v8 = vadd.f32 1.0, %v1903_v5  ;;  %v1082_v5 = vunpack.c.l.bf16 %v1524_v62 }
 0x52b   :  { %v1905_v9 = vpop.eup %1904 }
 0x52c   :  { %1910 = vrcp.f32 %v942_v8  ;;  %v943_v39 = vadd.f32 1.0, %v1905_v9  ;;  %v1907_v34 = vpop.eup %1906  ;;  %v1085_v8 = vunpack.c.l.bf16 %v1526_v63 }
 0x52d   :  { %v1909_v61 = vpop.eup %1908  ;;  %v956_v37 = vadd.f32 1.0, %v1907_v34  ;;  %v1083_v34 = vunpack.c.h.bf16 %v1524_v62 }
 0x52e   :  { %1912 = vrcp.f32 %v943_v39  ;;  %v957_v42 = vadd.f32 1.0, %v1909_v61 }
 0x52f   :  { %1914 = vrcp.f32 %v956_v37 }
 0x530   :  { %1916 = vrcp.f32 %v957_v42 }
 0x536   :  { %v1911_v12 = vpop.eup %1910 }
 0x537   :  { %v964_v43 = vmul.f32 %v1911_v12, %v962_v40  ;;  %v1086_v40 = vunpack.c.h.bf16 %v1526_v63 }
 0x538   :  { %v1913_v6 = vpop.eup %1912 }
 0x539   :  { %v966_v7 = vadd.f32 %v964_v43, %v930_v38  ;;  %v965_v11 = vmul.f32 %v1913_v6, %v963_v3  ;;  %v1915_v14 = vpop.eup %1914 }
 0x53a   :  { %v1917_v16 = vpop.eup %1916  ;;  %v970_v17 = vsub.f32 1.0, %v1915_v14  ;;  %v974_v56 = vmul.f32 %v1915_v14, %v2450_v0 }
 0x53b   :  { %1918 = vtanh.f32 %v966_v7  ;;  %v967_v13 = vadd.f32 %v965_v11, %v933_v46  ;;  %v971_v47 = vsub.f32 1.0, %v1917_v16  ;;  %v975_v22 = vmul.f32 %v1917_v16, %v2454_v49 }
 0x53d   :  { %1920 = vtanh.f32 %v967_v13 }
 0x545   :  { %v1919_v55 = vpop.eup %1918 }
 0x546   :  { %v972_v50 = vmul.f32 %v1919_v55, %v970_v17 }
 0x547   :  { %v1921_v20 = vpop.eup %1920 }
 0x548   :  { %v973_v23 = vmul.f32 %v1921_v20, %v971_v47  ;;  %v976_v10 = vadd.f32 %v974_v56, %v972_v50  ;;  %v1525_v50 = vld [vmem:[%s2783_s0 + $0x80] ss:$12 sps:$4 sm:$0xff]  }
 0x549   :  { %v1087_v63 = vunpack.c.h.bf16 %v1525_v50 }
 0x54a   :  { %v977_v24 = vadd.f32 %v975_v22, %v973_v23  ;;  %v2553_v25 = vsel %vm980_vm12, %v976_v10, %v2450_v0  ;;  %v2577_v0 = vld [vmem:[%s2781_s1 + $0x20] ss:$12 sps:$4 sm:$0xff]   ;;  %v1084_v22 = vunpack.c.l.bf16 %v1525_v50 }
 0x54b   :  { %v2683_v23 = vld [vmem:[%s2784_s2] ss:$0 sm:$0xff] }
 0x54c   :  { %v2557_v26 = vsel %vm981_vm13, %v977_v24, %v2454_v49  ;;  %v2586_v49 = vld [vmem:[%s2781_s1 + $0x38] ss:$12 sps:$4 sm:$0xff]  }
 0x54d   :  { %v992_v27 = vpack.c.bf16 %v2557_v26, %v2553_v25 }
 0x54f   :  { %1026 = vmatmul.mubr.bf16.vlgmr.msra.gmra.mrb[20].mxu0 %v992_v27  ;;  %1743 = vmatmul.mubr.bf16.vlgmr.msra.gmra.mrb[20].mxu1 %v992_v27 }
 0x550   :  { %1148 = vmatpush1.bf16.msra.mxu0 %v2461_v41  ;;  %1747 = vmatpush3.bf16.msra.mxu1 %v2565_v28 }
 0x551   :  { %1149 = vmatprep.subr.bf16.mxu0 %v2468_v44  ;;  %1748 = vmatprep.subr.bf16.mxu1 %v2007_v1 }
 0x552   :  { %1179 = vmatprep.mubr.bf16.mxu0 %v2008_v2  ;;  %1762 = vmatprep.mubr.msk.bf16.mxu1 %vm2009_vm0, %v2007_v1 }
 0x554   :  { %1150 = vmatpush1.bf16.msra.mxu0 %v2478_v45  ;;  %1749 = vmatpush3.bf16.msra.mxu1 %v2577_v0 }
 0x555   :  { %1151 = vmatprep.subr.bf16.mxu0 %v2485_v15  ;;  %1750 = vmatprep.subr.bf16.mxu1 %v2007_v1 }
 0x558   :  { %1152 = vmatpush1.bf16.msra.mxu0 %v2492_v51  ;;  %1751 = vmatpush3.bf16.msra.mxu1 %v2586_v49 }
 0x559   :  { %1153 = vmatprep.subr.bf16.mxu0 %v2499_v18  ;;  %1752 = vmatprep.subr.bf16.mxu1 %v2007_v1 }
 0x55c   :  { %1154 = vmatpush1.bf16.msra.mxu0 %v2506_v52  ;;  %1753 = vmatpush3.bf16.msra.mxu1 %v2595_v29 }
 0x55d   :  { %1155 = vmatprep.subr.bf16.mxu0 %v2513_v21  ;;  %1754 = vmatprep.subr.bf16.mxu1 %v2007_v1 }
 0x560   :  { %1156 = vmatpush1.bf16.msra.mxu0 %v2603_v30  ;;  %1755 = vmatpush3.bf16.msra.mxu1 %v2609_v32 }
 0x561   :  { %1157 = vmatprep.subr.bf16.mxu0 %v2615_v53  ;;  %1756 = vmatprep.subr.bf16.mxu1 %v2007_v1 }
 0x564   :  { %1158 = vmatpush1.bf16.msra.mxu0 %v2622_v54  ;;  %1757 = vmatpush3.bf16.msra.mxu1 %v2628_v48 }
 0x565   :  { %1159 = vmatprep.subr.bf16.mxu0 %v2634_v57  ;;  %1758 = vmatprep.subr.bf16.mxu1 %v2007_v1 }
 0x568   :  { %1160 = vmatpush1.bf16.msra.mxu0 %v2641_v36  ;;  %1759 = vmatpush3.bf16.msra.mxu1 %v2647_v33 }
 0x569   :  { %1161 = vmatprep.subr.bf16.mxu0 %v2653_v58  ;;  %1760 = vmatprep.subr.bf16.mxu1 %v2007_v1 }
 0x56c   :  { %1162 = vmatpush1.bf16.msra.mxu0 %v2660_v59  ;;  %1761 = vmatpush3.bf16.msra.mxu1 %v2666_v60 }
 0x56d   :  { %1301 = vmatprep.subr.bf16.mxu0 %v2534_v19  ;;  %1766 = vmatprep.subr.bf16.mxu1 %v2007_v1 }
 0x622   :  { %v1027_v9 = vpop.f32.mrb[20].mxu0  ;;  %v1070_v39 = vpop.f32.mrb[20].mxu1 }
 0x623   :  { %v1088_v61 = vadd.f32 %v1082_v5, %v1027_v9  ;;  %v1029_v35 = vpop.f32.mrb[21].mxu0  ;;  %v1744_v37 = vpop.f32.mrb[21].mxu1  ;;  %v1116_v10 = vadd.f32 %v2683_v23, %v1070_v39 }
 0x624   :  { %v1031_v38 = vpop.f32.mrb[22].mxu0  ;;  %v1073_v19 = vpop.f32.mrb[22].mxu1  ;;  %v1102_v3 = vadd.f32 %v1083_v34, %v1029_v35 }
 0x625   :  { %v1528_v42 = vmul.f32 -1.442695, %v1088_v61  ;;  %v1089_v12 = vadd.f32 %v1085_v8, %v1031_v38  ;;  %v1033_v43 = vpop.f32.mrb[23].mxu0  ;;  %v1745_v46 = vpop.f32.mrb[23].mxu1  ;;  %v1117_v5 = vadd.f32 %v2683_v23, %v1073_v19 }
 0x626   :  { %v1103_v7 = vadd.f32 %v1086_v40, %v1033_v43  ;;  %v1530_v11 = vmul.f32 -1.442695, %v1102_v3 }
 0x627   :  { %1922 = vpow2.f32 %v1528_v42  ;;  %v1529_v6 = vmul.f32 -1.442695, %v1089_v12 }
 0x628   :  { %v1531_v13 = vmul.f32 -1.442695, %v1103_v7 }
 0x629   :  { %1924 = vpow2.f32 %v1529_v6 }
 0x62a   :  { %1926 = vpow2.f32 %v1530_v11 }
 0x62b   :  { %1928 = vpow2.f32 %v1531_v13 }
 0x631   :  { %v1923_v14 = vpop.eup %1922 }
 0x632   :  { %v1096_v16 = vadd.f32 1.0, %v1923_v14 }
 0x633   :  { %v1925_v17 = vpop.eup %1924 }
 0x634   :  { %1930 = vrcp.f32 %v1096_v16  ;;  %v1097_v55 = vadd.f32 1.0, %v1925_v17  ;;  %v1927_v56 = vpop.eup %1926  ;;  %v1533_v16 = vld [vmem:[%s2783_s0 + $0x98] ss:$12 sps:$4 sm:$0xff]  }
 0x635   :  { %v1929_v47 = vpop.eup %1928  ;;  %v1110_v20 = vadd.f32 1.0, %v1927_v56 }
 0x636   :  { %1932 = vrcp.f32 %v1097_v55  ;;  %v1111_v24 = vadd.f32 1.0, %v1929_v47  ;;  %v1238_v55 = vunpack.c.l.bf16 %v1533_v16 }
 0x637   :  { %1934 = vrcp.f32 %v1110_v20 }
 0x638   :  { %1936 = vrcp.f32 %v1111_v24 }
 0x63e   :  { %v1931_v27 = vpop.eup %1930 }
 0x63f   :  { %v1118_v62 = vmul.f32 %v1931_v27, %v1116_v10 }
 0x640   :  { %v1933_v8 = vpop.eup %1932 }
 0x641   :  { %v1120_v9 = vadd.f32 %v1118_v62, %v1084_v22  ;;  %v1119_v34 = vmul.f32 %v1933_v8, %v1117_v5  ;;  %v1935_v35 = vpop.eup %1934  ;;  %v1241_v22 = vunpack.c.h.bf16 %v1533_v16 }
 0x642   :  { %v1937_v37 = vpop.eup %1936  ;;  %v1124_v38 = vsub.f32 1.0, %v1935_v35  ;;  %v1128_v39 = vmul.f32 %v1935_v35, %v2553_v25 }
 0x643   :  { %1938 = vtanh.f32 %v1120_v9  ;;  %v1121_v61 = vadd.f32 %v1119_v34, %v1087_v63  ;;  %v1125_v42 = vsub.f32 1.0, %v1937_v37  ;;  %v1129_v46 = vmul.f32 %v1937_v37, %v2557_v26 }
 0x645   :  { %1940 = vtanh.f32 %v1121_v61 }
 0x64d   :  { %v1939_v40 = vpop.eup %1938 }
 0x64e   :  { %v1126_v12 = vmul.f32 %v1939_v40, %v1124_v38 }
 0x64f   :  { %v1941_v43 = vpop.eup %1940 }
 0x650   :  { %v1127_v3 = vmul.f32 %v1941_v43, %v1125_v42  ;;  %v1130_v19 = vadd.f32 %v1128_v39, %v1126_v12 }
 0x652   :  { %v1131_v6 = vadd.f32 %v1129_v46, %v1127_v3  ;;  %v2691_v7 = vsel %vm1134_vm14, %v1130_v19, %v2553_v25  ;;  %v1540_v19 = vld [vmem:[%s2783_s0 + $0xa8] sm:$0xff] }
 0x654   :  { %v2695_v11 = vsel %vm1135_vm15, %v1131_v6, %v2557_v26  ;;  %v1542_v6 = vld [vmem:[%s2783_s0 + $0xb4] sm:$0xff] }
 0x655   :  { %v1146_v13 = vpack.c.bf16 %v2695_v11, %v2691_v7 }
 0x657   :  { %1180 = vmatmul.mubr.bf16.vlgmr.msra.gmra.mrb[24].mxu0 %v1146_v13  ;;  %1763 = vmatmul.mubr.bf16.vlgmr.msra.gmra.mrb[24].mxu1 %v1146_v13  ;;  %v1393_v13 = vunpack.c.l.bf16 %v1542_v6 }
 0x658   :  { %1302 = vmatpush1.bf16.msra.mxu0 %v2461_v41  ;;  %1767 = vmatpush3.bf16.msra.mxu1 %v2565_v28  ;;  %v1534_v41 = vld [vmem:[%s2783_s0 + $0x9c] sm:$0xff] }
 0x659   :  { %1303 = vmatprep.subr.bf16.mxu0 %v2468_v44  ;;  %1768 = vmatprep.subr.bf16.mxu1 %v2007_v1  ;;  %v1240_v28 = vunpack.c.h.bf16 %v1534_v41 }
 0x65a   :  { %1333 = vmatprep.mubr.bf16.mxu0 %v2008_v2  ;;  %1782 = vmatprep.mubr.msk.bf16.mxu1 %vm2009_vm0, %v2007_v1  ;;  %v1532_v2 = vld [vmem:[%s2783_s0 + $0x90] sm:$0xff]  ;;  %vm1288_vm0 = vcmp.gt.s32.totalorder %v2274_v4, 6 }
 0x65b   :  { %v1236_v44 = vunpack.c.l.bf16 %v1532_v2 }
 0x65c   :  { %1304 = vmatpush1.bf16.msra.mxu0 %v2478_v45  ;;  %1769 = vmatpush3.bf16.msra.mxu1 %v2577_v0  ;;  %v1239_v45 = vunpack.c.l.bf16 %v1534_v41 }
 0x65d   :  { %1305 = vmatprep.subr.bf16.mxu0 %v2485_v15  ;;  %1770 = vmatprep.subr.bf16.mxu1 %v2007_v1 }
 0x660   :  { %1306 = vmatpush1.bf16.msra.mxu0 %v2492_v51  ;;  %1771 = vmatpush3.bf16.msra.mxu1 %v2586_v49 }
 0x661   :  { %1307 = vmatprep.subr.bf16.mxu0 %v2499_v18  ;;  %1772 = vmatprep.subr.bf16.mxu1 %v2007_v1  ;;  %v1237_v18 = vunpack.c.h.bf16 %v1532_v2 }
 0x664   :  { %1308 = vmatpush1.bf16.msra.mxu0 %v2506_v52  ;;  %1773 = vmatpush3.bf16.msra.mxu1 %v2595_v29 }
 0x665   :  { %1309 = vmatprep.subr.bf16.mxu0 %v2513_v21  ;;  %1774 = vmatprep.subr.bf16.mxu1 %v2007_v1 }
 0x668   :  { %1310 = vmatpush1.bf16.msra.mxu0 %v2603_v30  ;;  %1775 = vmatpush3.bf16.msra.mxu1 %v2609_v32 }
 0x669   :  { %1311 = vmatprep.subr.bf16.mxu0 %v2615_v53  ;;  %1776 = vmatprep.subr.bf16.mxu1 %v2007_v1 }
 0x66c   :  { %1312 = vmatpush1.bf16.msra.mxu0 %v2622_v54  ;;  %1777 = vmatpush3.bf16.msra.mxu1 %v2628_v48 }
 0x66d   :  { %1313 = vmatprep.subr.bf16.mxu0 %v2634_v57  ;;  %1778 = vmatprep.subr.bf16.mxu1 %v2007_v1 }
 0x670   :  { %1314 = vmatpush1.bf16.msra.mxu0 %v2641_v36  ;;  %1779 = vmatpush3.bf16.msra.mxu1 %v2647_v33 }
 0x671   :  { %1315 = vmatprep.subr.bf16.mxu0 %v2653_v58  ;;  %1780 = vmatprep.subr.bf16.mxu1 %v2007_v1 }
 0x674   :  { %1316 = vmatpush1.bf16.msra.mxu0 %v2660_v59  ;;  %1781 = vmatpush3.bf16.msra.mxu1 %v2666_v60 }
 0x72a   :  { %v1181_v15 = vpop.f32.mrb[24].mxu0  ;;  %v1224_v51 = vpop.f32.mrb[24].mxu1 }
 0x72b   :  { %v1242_v52 = vadd.f32 %v1236_v44, %v1181_v15  ;;  %v1183_v21 = vpop.f32.mrb[25].mxu0  ;;  %v1764_v1 = vpop.f32.mrb[25].mxu1  ;;  %v1270_v56 = vadd.f32 %v2683_v23, %v1224_v51  ;;  %v1391_v44 = vunpack.c.h.bf16 %v1540_v19 }
 0x72c   :  { %v1185_v25 = vpop.f32.mrb[26].mxu0  ;;  %v1227_v26 = vpop.f32.mrb[26].mxu1  ;;  %v1256_v32 = vadd.f32 %v1237_v18, %v1183_v21 }
 0x72d   :  { %v1536_v0 = vmul.f32 -1.442695, %v1242_v52  ;;  %v1243_v49 = vadd.f32 %v1239_v45, %v1185_v25  ;;  %v1187_v29 = vpop.f32.mrb[27].mxu0  ;;  %v1765_v30 = vpop.f32.mrb[27].mxu1  ;;  %v1271_v10 = vadd.f32 %v2683_v23, %v1227_v26  ;;  %v1394_v52 = vunpack.c.h.bf16 %v1542_v6 }
 0x72e   :  { %v1257_v54 = vadd.f32 %v1240_v28, %v1187_v29  ;;  %v1538_v48 = vmul.f32 -1.442695, %v1256_v32 }
 0x72f   :  { %1942 = vpow2.f32 %v1536_v0  ;;  %v1537_v53 = vmul.f32 -1.442695, %v1243_v49 }
 0x730   :  { %v1539_v57 = vmul.f32 -1.442695, %v1257_v54 }
 0x731   :  { %1944 = vpow2.f32 %v1537_v53 }
 0x732   :  { %1946 = vpow2.f32 %v1538_v48 }
 0x733   :  { %1948 = vpow2.f32 %v1539_v57 }
 0x739   :  { %v1943_v36 = vpop.eup %1942 }
 0x73a   :  { %v1250_v33 = vadd.f32 1.0, %v1943_v36 }
 0x73b   :  { %v1945_v58 = vpop.eup %1944 }
 0x73c   :  { %1950 = vrcp.f32 %v1250_v33  ;;  %v1251_v59 = vadd.f32 1.0, %v1945_v58  ;;  %v1947_v60 = vpop.eup %1946  ;;  %v1541_v33 = vld [vmem:[%s2783_s0 + $0xb0] sm:$0xf] }
 0x73d   :  { %v1949_v14 = vpop.eup %1948  ;;  %v1264_v17 = vadd.f32 1.0, %v1947_v60  ;;  %v1392_v60 = vunpack.c.l.bf16 %v1541_v33 }
 0x73e   :  { %1952 = vrcp.f32 %v1251_v59  ;;  %v1265_v47 = vadd.f32 1.0, %v1949_v14  ;;  %v1543_v59 = vld [vmem:[%s2783_s0 + $0xbc] sm:$0xf] }
 0x73f   :  { %1954 = vrcp.f32 %v1264_v17 }
 0x740   :  { %1956 = vrcp.f32 %v1265_v47 }
 0x746   :  { %v1951_v50 = vpop.eup %1950 }
 0x747   :  { %v1272_v20 = vmul.f32 %v1951_v50, %v1270_v56  ;;  %v1395_v56 = vunpack.c.l.bf16 %v1543_v59 }
 0x748   :  { %v1953_v24 = vpop.eup %1952 }
 0x749   :  { %v1274_v27 = vadd.f32 %v1272_v20, %v1238_v55  ;;  %v1273_v62 = vmul.f32 %v1953_v24, %v1271_v10  ;;  %v1955_v5 = vpop.eup %1954 }
 0x74a   :  { %v1957_v8 = vpop.eup %1956  ;;  %v1278_v9 = vsub.f32 1.0, %v1955_v5  ;;  %v1282_v61 = vmul.f32 %v1955_v5, %v2691_v7 }
 0x74b   :  { %1958 = vtanh.f32 %v1274_v27  ;;  %v1275_v63 = vadd.f32 %v1273_v62, %v1241_v22  ;;  %v1279_v35 = vsub.f32 1.0, %v1957_v8  ;;  %v1283_v40 = vmul.f32 %v1957_v8, %v2695_v11 }
 0x74d   :  { %1960 = vtanh.f32 %v1275_v63 }
 0x755   :  { %v1959_v34 = vpop.eup %1958 }
 0x756   :  { %v1280_v37 = vmul.f32 %v1959_v34, %v1278_v9 }
 0x757   :  { %v1961_v38 = vpop.eup %1960 }
 0x758   :  { %v1281_v39 = vmul.f32 %v1961_v38, %v1279_v35  ;;  %v1284_v42 = vadd.f32 %v1282_v61, %v1280_v37 }
 0x75a   :  { %v1285_v12 = vadd.f32 %v1283_v40, %v1281_v39  ;;  %v2747_v43 = vsel %vm1288_vm0, %v1284_v42, %v2691_v7  ;;  %v1390_v7 = vunpack.c.l.bf16 %v1540_v19 }
 0x75c   :  { %v2751_v46 = vsel %vm1289_vm1, %v1285_v12, %v2695_v11 }
 0x75d   :  { %v1300_v3 = vpack.c.bf16 %v2751_v46, %v2747_v43 }
 0x75f   :  { %1334 = vmatmul.mubr.bf16.vlgmr.msra.gmra.mrb[28].mxu0 %v1300_v3  ;;  %1783 = vmatmul.mubr.bf16.vlgmr.msra.gmra.mrb[28].mxu1 %v1300_v3 }
 0x832   :  { %v1335_v2 = vpop.f32.mrb[28].mxu0  ;;  %v1378_v41 = vpop.f32.mrb[28].mxu1 }
 0x833   :  { %v1396_v11 = vadd.f32 %v1390_v7, %v1335_v2  ;;  %v1337_v45 = vpop.f32.mrb[29].mxu0  ;;  %v1784_v15 = vpop.f32.mrb[29].mxu1  ;;  %v1424_v14 = vadd.f32 %v2683_v23, %v1378_v41 }
 0x834   :  { %v1339_v51 = vpop.f32.mrb[30].mxu0  ;;  %v1381_v18 = vpop.f32.mrb[30].mxu1  ;;  %v1410_v28 = vadd.f32 %v1391_v44, %v1337_v45 }
 0x835   :  { %v1544_v21 = vmul.f32 -1.442695, %v1396_v11  ;;  %v1397_v1 = vadd.f32 %v1393_v13, %v1339_v51  ;;  %v1341_v25 = vpop.f32.mrb[31].mxu0  ;;  %v1785_v26 = vpop.f32.mrb[31].mxu1  ;;  %v1425_v47 = vadd.f32 %v2683_v23, %v1381_v18 }
 0x836   :  { %v1411_v49 = vadd.f32 %v1394_v52, %v1341_v25  ;;  %v1546_v29 = vmul.f32 -1.442695, %v1410_v28 }
 0x837   :  { %1962 = vpow2.f32 %v1544_v21  ;;  %v1545_v0 = vmul.f32 -1.442695, %v1397_v1 }
 0x838   :  { %v1547_v30 = vmul.f32 -1.442695, %v1411_v49 }
 0x839   :  { %1964 = vpow2.f32 %v1545_v0 }
 0x83a   :  { %1966 = vpow2.f32 %v1546_v29 }
 0x83b   :  { %1968 = vpow2.f32 %v1547_v30 }
 0x841   :  { %v1963_v32 = vpop.eup %1962 }
 0x842   :  { %v1404_v53 = vadd.f32 1.0, %v1963_v32 }
 0x843   :  { %v1965_v54 = vpop.eup %1964 }
 0x844   :  { %1970 = vrcp.f32 %v1404_v53  ;;  %v1405_v48 = vadd.f32 1.0, %v1965_v54  ;;  %v1967_v57 = vpop.eup %1966 }
 0x845   :  { %v1969_v36 = vpop.eup %1968  ;;  %v1418_v58 = vadd.f32 1.0, %v1967_v57 }
 0x846   :  { %1972 = vrcp.f32 %v1405_v48  ;;  %v1419_v16 = vadd.f32 1.0, %v1969_v36 }
 0x847   :  { %1974 = vrcp.f32 %v1418_v58 }
 0x848   :  { %1976 = vrcp.f32 %v1419_v16 }
 0x84e   :  { %v1971_v17 = vpop.eup %1970 }
 0x84f   :  { %v1426_v55 = vmul.f32 %v1971_v17, %v1424_v14 }
 0x850   :  { %v1973_v50 = vpop.eup %1972 }
 0x851   :  { %v1428_v20 = vadd.f32 %v1426_v55, %v1392_v60  ;;  %v1427_v22 = vmul.f32 %v1973_v50, %v1425_v47  ;;  %v1975_v24 = vpop.eup %1974 }
 0x852   :  { %v1977_v27 = vpop.eup %1976  ;;  %v1432_v62 = vsub.f32 1.0, %v1975_v24  ;;  %v1436_v8 = vmul.f32 %v1975_v24, %v2747_v43 }
 0x853   :  { %1978 = vtanh.f32 %v1428_v20  ;;  %v1429_v10 = vadd.f32 %v1427_v22, %v1395_v56  ;;  %v1433_v9 = vsub.f32 1.0, %v1977_v27  ;;  %v1437_v23 = vmul.f32 %v1977_v27, %v2751_v46 }
 0x855   :  { %1980 = vtanh.f32 %v1429_v10 }
 0x85d   :  { %v1979_v63 = vpop.eup %1978 }
 0x85e   :  { %v1434_v5 = vmul.f32 %v1979_v63, %v1432_v62 }
 0x85f   :  { %v1981_v34 = vpop.eup %1980 }
 0x860   :  { %v1438_v61 = vadd.f32 %v1436_v8, %v1434_v5  ;;  %v1435_v35 = vmul.f32 %v1981_v34, %v1433_v9 }
 0x862   :  { %v1448_v37 = vsel %vm1442_vm2, %v1438_v61, %v2747_v43  ;;  %v1439_v38 = vadd.f32 %v1437_v23, %v1435_v35 }
 0x863   :  { %1457 = vst [vmem:[%s2785_s4] sm:$0xff] %v1448_v37 }
 0x864   :  { %v1449_v40 = vsel %vm1443_vm3, %v1439_v38, %v2751_v46 }
 0x865   :  { %1458 = vst [vmem:[%s2785_s4 + $0x8] sm:$0xff] %v1449_v40 }

// kernel: shared_rnn_forward.3
= control target key start
LH: loop header
LB: loop body
LE: loop exit
PB: predicated region body
PF: predicated region fallthrough
CT: control target
= control target key end

     0   :  { %s1274_s12 = smov 0   ;;  %s1276_s13 = smov 0   ;;  %s1441_s0 = inlined_call_operand.vmem [shape: bf16[2,16,768], index: 0, kind: input, shape index: {}]   ;;  %s1442_s1 = inlined_call_operand.vmem [shape: bf16[2,128,384], index: 1, kind: input, shape index: {}]   ;;  %s1443_s2 = inlined_call_operand.vmem [shape: f32[2,1,128], index: 2, kind: input, shape index: {}]   ;;  %s1444_s3 = inlined_call_operand.vmem [shape: bf16[2,2,16,128], index: 3, kind: output, shape index: {}]  }
   0x1   :  { %s1278_s14 = smov 0   ;;  %s1280_s15 = smov 0  }
   0x2   :  { %s1282_s16 = smov 0  }
   0x3 LB: > { %s25_s17 = sadd.s32 1, %s1244_s15  ;;  %p49_p1 = scmp.ne.s32.totalorder %s1236_s13, %s1232_s12  ;;  %s1248_s16 = sphi %s1282_s16, %s13_s16   ;;  %s1244_s15 = sphi %s1280_s15, %s1448_s15   ;;  %s1240_s14 = sphi %s1278_s14, %s1447_s14   ;;  %s1236_s13 = sphi %s1276_s13, %s1446_s13   ;;  %s1232_s12 = sphi %s1274_s12, %s1445_s12  }
   0x4   : > { %p27_p0 = scmp.ge.s32.totalorder %s25_s17, 2  ;;  %p50_p2 = scmp.eq.s32.totalorder %s1248_s16, 0 }
   0x5   : > { %s42_s19 = sadd.s32 1, %s1236_s13  ;;  %p954_p5 = scmp.ge.s32.totalorder %s1248_s16, 2 }
   0x6   : > { %s1450_s17 = smov (%p27_p0, %s25_s17), 0  ;;  %p51_p3 = por %p50_p2, %p49_p1 }
   0x7   : > { %s38_s18 = ssub.s32 %s1244_s15, %s1450_s17  ;;  %163 = sbr.rel (%p954_p5) target bundleno = 23 (0x17), region = 16 }
   0x8   : > { %p40_p4 = scmp.eq.s32.totalorder %s38_s18, 0 }
   0xa   : > { %s1309_s20 = scalar_select %p40_p4, %s1236_s13, %s42_s19  }
   0xe   : > { %166 = sbr.rel (!%p51_p3) target bundleno = 23 (0x17), region = 20  ;;  %s168_s21 = sand.u32 (%p51_p3), 1, %s1236_s13  }
   0xf   : > { %s1013_s22 = smul.u32 (%p51_p3), 12, %s1244_s15 }
  0x10   : > { %s1091_s23 = smul.u32 (%p51_p3), 48, %s168_s21 }
  0x11   : > { %s180_s26 = scalar_lea.vmem (%p51_p3), %s1441_s0, %s1013_s22 }
  0x12   : > { %v195_v0 = vld [vmem:[%s180_s26] sm:$0xff] (%p51_p3)  ;;  %v197_v1 = vld [vmem:[%s180_s26 + $0x18] sm:$0xff] (%p51_p3)  ;;  %v199_v2 = vld [vmem:[%s180_s26 + $0x30] sm:$0xff] (%p51_p3)  ;;  %s170_s27 = scalar_lea.vmem (%p51_p3), [#allocation3], %s1091_s23 }
  0x13   : > { %196 = vst [vmem:[%s170_s27] sm:$0xff] (%p51_p3), %v195_v0  ;;  %198 = vst [vmem:[%s170_s27 + $0xc] sm:$0xff] (%p51_p3), %v197_v1  ;;  %v201_v3 = vld [vmem:[%s180_s26 + $0x48] sm:$0xff] (%p51_p3)  ;;  %v958_v5 = vld [vmem:[%s180_s26 + $0x20] sm:$0xf] (%p51_p3) }
  0x14   : > { %200 = vst [vmem:[%s170_s27 + $0x18] sm:$0xff] (%p51_p3), %v199_v2  ;;  %v956_v4 = vld [vmem:[%s180_s26 + $0x8] sm:$0xf] (%p51_p3)  ;;  %202 = vst [vmem:[%s170_s27 + $0x24] sm:$0xff] (%p51_p3), %v201_v3  ;;  %v960_v6 = vld [vmem:[%s180_s26 + $0x38] sm:$0xf] (%p51_p3) }
  0x15   : > { %957 = vst [vmem:[%s170_s27 + $0x8] sm:$0xf] %v956_v4  ;;  %959 = vst [vmem:[%s170_s27 + $0x14] sm:$0xf] %v958_v5  ;;  %v962_v7 = vld [vmem:[%s180_s26 + $0x50] sm:$0xf] }
  0x16   : > { %961 = vst [vmem:[%s170_s27 + $0x20] sm:$0xf] %v960_v6  ;;  %963 = vst [vmem:[%s170_s27 + $0x2c] sm:$0xf] %v962_v7 }
  0x17 PF: > { %p964_p6 = scmp.ge.s32.totalorder %s1248_s16, 1  ;;  %p236_p7 = scmp.lt.s32.totalorder %s1248_s16, 3 }
  0x19   : > { %p237_p8 = pnand %p964_p6, %p236_p7 }
  0x1a   : > { %p289_p9 = scmp.lt.s32.totalorder (!%p237_p8), %s1240_s14, 1  ;;  %v1250_v8 = vmov (!%p237_p8), 0.0   ;;  %v1251_v9 = vmov (!%p237_p8), 0   ;;  %vm1252_vm0 = vmmov (!%p237_p8), 0   ;;  %v1253_v33 = vmov (!%p237_p8), 0.0|0.0   ;;  %s243_s6 = sand.u32 (!%p237_p8), 1, %s1232_s12  }
  0x1b   : > { %240 = sbr.rel (%p237_p8) target bundleno = 599 (0x257), region = 54  ;;  %1051 = vmatprep.subr.bf16.mxu1 (!%p237_p8), %v1250_v8  ;;  %519 = vmatprep.mubr.bf16.mxu0 (!%p237_p8), %v1251_v9  ;;  %s1018_s24 = sshll.u32 (!%p237_p8), %s1240_s14, 3 }
  0x1c   : > { %1067 = vmatprep.mubr.msk.bf16.mxu1 (!%p237_p8), %vm1252_vm0, %v1250_v8  ;;  %s1376_s7 = smul.u32 (!%p237_p8), 48, %s243_s6  ;;  %s649_s26 = ssub.s32 (!%p237_p8), 1, %s1240_s14 }
  0x1d   : > { %s1015_s8 = smul.u32 (!%p237_p8), 24, %s1240_s14 }
  0x1e   : > { %s245_s9 = scalar_lea.vmem (!%p237_p8), [#allocation3], %s1376_s7  ;;  %s1019_s27 = smul.u32 (!%p237_p8), 24, %s649_s26 }
  0x1f   : > { %s1382_s10 = scalar_lea.vmem (!%p237_p8), %s245_s9, %s1015_s8 [#allocation3] }
  0x20   : > { %v574_v35 = vld [vmem:[%s1382_s10] sm:$0xff] (!%p237_p8)  ;;  %v576_v36 = vld [vmem:[%s1382_s10 + $0xc] sm:$0xff] (!%p237_p8)  ;;  %v575_v0 = vld [vmem:[%s1382_s10 + $0x8] ss:$12 sps:$4 sm:$0xff] (!%p237_p8)  }
  0x21   : > { %v578_v37 = vunpack.c.l.bf16 (!%p237_p8), %v574_v35  ;;  %v581_v38 = vunpack.c.l.bf16 (!%p237_p8), %v576_v36  ;;  %v579_v40 = vunpack.c.h.bf16 (!%p237_p8), %v574_v35  ;;  %v582_v44 = vunpack.c.h.bf16 (!%p237_p8), %v576_v36 }
  0x22   : > { %s1323_s28 = scalar_select %p289_p9, %s1240_s14, 1  ;;  %v580_v4 = vunpack.c.l.bf16 %v575_v0  ;;  %v583_v7 = vunpack.c.h.bf16 %v575_v0 }
  0x24   : > { %s1093_s29 = smul.u32 192, %s1323_s28  ;;  %s296_s18 = scalar_lea.vmem %s1443_s2, %s1323_s28 }
  0x25   : > { %v1390_v62 = vld [vmem:[%s296_s18] ss:$0 sm:$0xff]  ;;  %s1014_s19 = sshll.u32 %s1323_s28, 4  ;;  %s1414_s28 = scalar_lea.vmem %s245_s9, %s1019_s27 [#allocation3] }
  0x26   : > { %s1331_s5 = scalar_lea.vmem %s1442_s1, %s1093_s29  ;;  %s1399_s23 = scalar_lea.vmem %s1444_s3, %s1014_s19 }
  0x27   : > { %v1138_v10 = vld [vmem:[%s1331_s5 + $0x4] ss:$12 sps:$4 sm:$0xff]   ;;  %v1140_v11 = vld [vmem:[%s1331_s5] ss:$12 sps:$4 sm:$0xff]   ;;  %v1141_v12 = vld [vmem:[%s1331_s5 + $0x1c] ss:$12 sps:$4 sm:$0xff]   ;;  %s646_s25 = scalar_lea.vmem %s1399_s23, %s1018_s24 }
  0x28   : > { %487 = vmatprep.subr.bf16.mxu0 %v1138_v10  ;;  %v1143_v13 = vld [vmem:[%s1331_s5 + $0x18] ss:$12 sps:$4 sm:$0xff]   ;;  %v1144_v14 = vld [vmem:[%s1331_s5 + $0x34] ss:$12 sps:$4 sm:$0xff]   ;;  %v1146_v15 = vld [vmem:[%s1331_s5 + $0x30] ss:$12 sps:$4 sm:$0xff]  }
  0x29   : > { %488 = vmatpush1.bf16.msra.mxu0 %v1140_v11  ;;  %v1147_v16 = vld [vmem:[%s1331_s5 + $0x4c] ss:$12 sps:$4 sm:$0xff]   ;;  %v1158_v17 = vld [vmem:[%s1331_s5 + $0x8] ss:$12 sps:$4 sm:$0xff]   ;;  %v1150_v19 = vld [vmem:[%s1331_s5 + $0x64] ss:$12 sps:$4 sm:$0xff]  }
  0x2a   : > { %489 = vmatprep.subr.bf16.mxu0 %v1141_v12  ;;  %v1149_v18 = vld [vmem:[%s1331_s5 + $0x48] ss:$12 sps:$4 sm:$0xff]   ;;  %1052 = vmatpush3.bf16.msra.mxu1 %v1158_v17  ;;  %v1162_v20 = vld [vmem:[%s1331_s5 + $0x20] ss:$12 sps:$4 sm:$0xff]   ;;  %v1164_v22 = vld [vmem:[%s1331_s5 + $0x38] ss:$12 sps:$4 sm:$0xff]  }
  0x2b   : > { %1053 = vmatprep.subr.bf16.mxu1 %v1250_v8  ;;  %v1152_v21 = vld [vmem:[%s1331_s5 + $0x60] ss:$12 sps:$4 sm:$0xff]   ;;  %v1153_v23 = vld [vmem:[%s1331_s5 + $0x7c] ss:$12 sps:$4 sm:$0xff]   ;;  %v1155_v24 = vld [vmem:[%s1331_s5 + $0x78] ss:$12 sps:$4 sm:$0xff]  }
  0x2c   : > { %v1165_v25 = vld [vmem:[%s1331_s5 + $0x50] ss:$12 sps:$4 sm:$0xff]   ;;  %v1156_v26 = vld [vmem:[%s1331_s5 + $0x94] ss:$12 sps:$4 sm:$0xff]   ;;  %v1160_v29 = vld [vmem:[%s1331_s5 + $0xac] ss:$12 sps:$4 sm:$0xff]  }
  0x2d   : > { %490 = vmatpush1.bf16.msra.mxu0 %v1143_v13  ;;  %v1159_v27 = vld [vmem:[%s1331_s5 + $0x90] ss:$12 sps:$4 sm:$0xff]   ;;  %v1166_v28 = vld [vmem:[%s1331_s5 + $0x68] ss:$12 sps:$4 sm:$0xff]   ;;  %v1167_v31 = vld [vmem:[%s1331_s5 + $0x80] ss:$12 sps:$4 sm:$0xff]  }
  0x2e   : > { %491 = vmatprep.subr.bf16.mxu0 %v1144_v14  ;;  %1054 = vmatpush3.bf16.msra.mxu1 %v1162_v20  ;;  %v1163_v30 = vld [vmem:[%s1331_s5 + $0xa8] ss:$12 sps:$4 sm:$0xff]   ;;  %v1168_v32 = vld [vmem:[%s1331_s5 + $0x98] ss:$12 sps:$4 sm:$0xff]   ;;  %v1169_v34 = vld [vmem:[%s1331_s5 + $0xb0] ss:$12 sps:$4 sm:$0xff]  }
  0x2f   : > { %1055 = vmatprep.subr.bf16.mxu1 %v1250_v8  ;;  %s1022_s29 = sshll.u32 %s649_s26, 3 }
  0x30   : > { %s806_s30 = scalar_lea.vmem %s1399_s23, %s1022_s29 }
  0x31   : > { %492 = vmatpush1.bf16.msra.mxu0 %v1146_v15 }
  0x32   : > { %493 = vmatprep.subr.bf16.mxu0 %v1147_v16  ;;  %1056 = vmatpush3.bf16.msra.mxu1 %v1164_v22 }
  0x33   : > { %1057 = vmatprep.subr.bf16.mxu1 %v1250_v8 }
  0x35   : > { %494 = vmatpush1.bf16.msra.mxu0 %v1149_v18 }
  0x36   : > { %495 = vmatprep.subr.bf16.mxu0 %v1150_v19  ;;  %1058 = vmatpush3.bf16.msra.mxu1 %v1165_v25 }
  0x37   : > { %1059 = vmatprep.subr.bf16.mxu1 %v1250_v8 }
  0x39   : > { %496 = vmatpush1.bf16.msra.mxu0 %v1152_v21 }
  0x3a   : > { %497 = vmatprep.subr.bf16.mxu0 %v1153_v23  ;;  %1060 = vmatpush3.bf16.msra.mxu1 %v1166_v28 }
  0x3b   : > { %1061 = vmatprep.subr.bf16.mxu1 %v1250_v8 }
  0x3d   : > { %498 = vmatpush1.bf16.msra.mxu0 %v1155_v24 }
  0x3e   : > { %499 = vmatprep.subr.bf16.mxu0 %v1156_v26  ;;  %1062 = vmatpush3.bf16.msra.mxu1 %v1167_v31 }
  0x3f   : > { %1063 = vmatprep.subr.bf16.mxu1 %v1250_v8 }
  0x41   : > { %500 = vmatpush1.bf16.msra.mxu0 %v1159_v27 }
  0x42   : > { %501 = vmatprep.subr.bf16.mxu0 %v1160_v29  ;;  %1064 = vmatpush3.bf16.msra.mxu1 %v1168_v32 }
  0x43   : > { %1065 = vmatprep.subr.bf16.mxu1 %v1250_v8 }
  0x45   : > { %502 = vmatpush1.bf16.msra.mxu0 %v1163_v30 }
  0x46   : > { %653 = vmatprep.subr.bf16.mxu0 %v1138_v10  ;;  %1066 = vmatpush3.bf16.msra.mxu1 %v1169_v34 }
  0x47   : > { %1071 = vmatprep.subr.bf16.mxu1 %v1250_v8 }
  0x48   : > { %520 = vmatmul.mubr.bf16.vlgmr.msra.gmra.mrb[0].mxu0 %v1253_v33 }
  0x49   : > { %654 = vmatpush1.bf16.msra.mxu0 %v1140_v11  ;;  %685 = vmatprep.mubr.bf16.mxu0 %v1251_v9 }
  0x4a   : > { %655 = vmatprep.subr.bf16.mxu0 %v1141_v12  ;;  %1068 = vmatmul.mubr.bf16.vlgmr.msra.gmra.mrb[0].mxu1 %v1253_v33 }
  0x4b   : > { %1072 = vmatpush3.bf16.msra.mxu1 %v1158_v17  ;;  %1087 = vmatprep.mubr.msk.bf16.mxu1 %vm1252_vm0, %v1250_v8 }
  0x4c   : > { %1073 = vmatprep.subr.bf16.mxu1 %v1250_v8 }
  0x4d   : > { %656 = vmatpush1.bf16.msra.mxu0 %v1143_v13 }
  0x4e   : > { %657 = vmatprep.subr.bf16.mxu0 %v1144_v14 }
  0x4f   : > { %1074 = vmatpush3.bf16.msra.mxu1 %v1162_v20 }
  0x50   : > { %1075 = vmatprep.subr.bf16.mxu1 %v1250_v8 }
  0x51   : > { %658 = vmatpush1.bf16.msra.mxu0 %v1146_v15 }
  0x52   : > { %659 = vmatprep.subr.bf16.mxu0 %v1147_v16 }
  0x53   : > { %1076 = vmatpush3.bf16.msra.mxu1 %v1164_v22 }
  0x54   : > { %1077 = vmatprep.subr.bf16.mxu1 %v1250_v8 }
  0x55   : > { %660 = vmatpush1.bf16.msra.mxu0 %v1149_v18 }
  0x56   : > { %661 = vmatprep.subr.bf16.mxu0 %v1150_v19 }
  0x57   : > { %1078 = vmatpush3.bf16.msra.mxu1 %v1165_v25 }
  0x58   : > { %1079 = vmatprep.subr.bf16.mxu1 %v1250_v8 }
  0x59   : > { %662 = vmatpush1.bf16.msra.mxu0 %v1152_v21 }
  0x5a   : > { %663 = vmatprep.subr.bf16.mxu0 %v1153_v23 }
  0x5b   : > { %1080 = vmatpush3.bf16.msra.mxu1 %v1166_v28 }
  0x5c   : > { %1081 = vmatprep.subr.bf16.mxu1 %v1250_v8 }
  0x5d   : > { %664 = vmatpush1.bf16.msra.mxu0 %v1155_v24 }
  0x5e   : > { %665 = vmatprep.subr.bf16.mxu0 %v1156_v26  ;;  %v740_v26 = vld [vmem:[%s1414_s28] sm:$0xff] }
  0x5f   : > { %1082 = vmatpush3.bf16.msra.mxu1 %v1167_v31  ;;  %v744_v28 = vunpack.c.l.bf16 %v740_v26 }
  0x60   : > { %1083 = vmatprep.subr.bf16.mxu1 %v1250_v8 }
  0x61   : > { %666 = vmatpush1.bf16.msra.mxu0 %v1159_v27  ;;  %v742_v27 = vld [vmem:[%s1414_s28 + $0xc] sm:$0xff] }
  0x62   : > { %667 = vmatprep.subr.bf16.mxu0 %v1160_v29  ;;  %v747_v29 = vunpack.c.l.bf16 %v742_v27 }
  0x63   : > { %1084 = vmatpush3.bf16.msra.mxu1 %v1168_v32  ;;  %v745_v32 = vunpack.c.h.bf16 %v740_v26 }
  0x64   : > { %1085 = vmatprep.subr.bf16.mxu1 %v1250_v8 }
  0x65   : > { %668 = vmatpush1.bf16.msra.mxu0 %v1163_v30 }
  0x67   : > { %1086 = vmatpush3.bf16.msra.mxu1 %v1169_v34 }
 0x11b   : > { %v521_v39 = vpop.f32.mrb[0].mxu0 }
 0x11c   : > { %v584_v41 = vadd.f32 %v578_v37, %v521_v39  ;;  %v523_v42 = vpop.f32.mrb[1].mxu0 }
 0x11d   : > { %v525_v43 = vpop.f32.mrb[2].mxu0  ;;  %v598_v48 = vadd.f32 %v579_v40, %v523_v42  ;;  %v564_v52 = vpop.f32.mrb[0].mxu1 }
 0x11e   : > { %v993_v45 = vmul.f32 -1.442695, %v584_v41  ;;  %v585_v46 = vadd.f32 %v581_v38, %v525_v43  ;;  %v527_v47 = vpop.f32.mrb[3].mxu0  ;;  %v1069_v53 = vpop.f32.mrb[1].mxu1  ;;  %v618_v2 = vadd.f32 %v1390_v62, %v564_v52  ;;  %v748_v38 = vunpack.c.h.bf16 %v742_v27 }
 0x11f   : > { %v599_v50 = vadd.f32 %v582_v44, %v527_v47  ;;  %v995_v51 = vmul.f32 -1.442695, %v598_v48  ;;  %v567_v55 = vpop.f32.mrb[2].mxu1 }
 0x120   : > { %1170 = vpow2.f32 %v993_v45  ;;  %v994_v49 = vmul.f32 -1.442695, %v585_v46  ;;  %v1070_v56 = vpop.f32.mrb[3].mxu1  ;;  %v619_v8 = vadd.f32 %v1390_v62, %v567_v55 }
 0x121   : > { %v996_v54 = vmul.f32 -1.442695, %v599_v50 }
 0x122   : > { %1172 = vpow2.f32 %v994_v49 }
 0x123   : > { %1174 = vpow2.f32 %v995_v51 }
 0x124   : > { %1176 = vpow2.f32 %v996_v54  ;;  %v741_v54 = vld [vmem:[%s1414_s28 + $0x8] ss:$12 sps:$4 sm:$0xff]  }
 0x125   : > { %v746_v56 = vunpack.c.l.bf16 %v741_v54 }
 0x12a   : > { %v1171_v57 = vpop.eup %1170 }
 0x12b   : > { %v592_v58 = vadd.f32 1.0, %v1171_v57 }
 0x12c   : > { %v1173_v59 = vpop.eup %1172 }
 0x12d   : > { %1178 = vrcp.f32 %v592_v58  ;;  %v593_v60 = vadd.f32 1.0, %v1173_v59  ;;  %v1175_v61 = vpop.eup %1174 }
 0x12e   : > { %v1177_v63 = vpop.eup %1176  ;;  %v606_v1 = vadd.f32 1.0, %v1175_v61  ;;  %v749_v61 = vunpack.c.h.bf16 %v741_v54 }
 0x12f   : > { %1180 = vrcp.f32 %v593_v60  ;;  %v607_v3 = vadd.f32 1.0, %v1177_v63 }
 0x130   : > { %1182 = vrcp.f32 %v606_v1 }
 0x131   : > { %1184 = vrcp.f32 %v607_v3 }
 0x137   : > { %v1179_v5 = vpop.eup %1178 }
 0x138   : > { %v620_v6 = vmul.f32 %v1179_v5, %v618_v2 }
 0x139   : > { %v1181_v9 = vpop.eup %1180 }
 0x13a   : > { %v622_v10 = vadd.f32 %v620_v6, %v580_v4  ;;  %v621_v11 = vmul.f32 %v1181_v9, %v619_v8  ;;  %v1183_v13 = vpop.eup %1182 }
 0x13b   : > { %v1185_v14 = vpop.eup %1184  ;;  %v626_v15 = vsub.f32 1.0, %v1183_v13  ;;  %v630_v19 = vmul.f32 0.0, %v1183_v13 }
 0x13c   : > { %1186 = vtanh.f32 %v622_v10  ;;  %v623_v12 = vadd.f32 %v621_v11, %v583_v7  ;;  %v627_v17 = vsub.f32 1.0, %v1185_v14  ;;  %v631_v22 = vmul.f32 0.0, %v1185_v14 }
 0x13e   : > { %1188 = vtanh.f32 %v623_v12 }
 0x146   : > { %v1187_v16 = vpop.eup %1186 }
 0x147   : > { %v628_v18 = vmul.f32 %v1187_v16, %v626_v15 }
 0x148   : > { %v1189_v20 = vpop.eup %1188 }
 0x149   : > { %v629_v21 = vmul.f32 %v1189_v20, %v627_v17  ;;  %v1401_v23 = vadd.f32 %v630_v19, %v628_v18 }
 0x14b   : > { %v1404_v24 = vadd.f32 %v631_v22, %v629_v21 }
 0x14d   : > { %v1026_v25 = vpack.c.bf16 %v1404_v24, %v1401_v23 }
 0x14f   : > { %1027 = vst [vmem:[%s646_s25] sm:$0xff] %v1026_v25   ;;  %686 = vmatmul.mubr.bf16.vlgmr.msra.gmra.mrb[4].mxu0 %v1026_v25  ;;  %1088 = vmatmul.mubr.bf16.vlgmr.msra.gmra.mrb[4].mxu1 %v1026_v25 }
 0x222   : > { %v687_v30 = vpop.f32.mrb[4].mxu0  ;;  %v730_v31 = vpop.f32.mrb[4].mxu1 }
 0x223   : > { %v750_v33 = vadd.f32 %v744_v28, %v687_v30  ;;  %v689_v34 = vpop.f32.mrb[5].mxu0  ;;  %v1089_v35 = vpop.f32.mrb[5].mxu1  ;;  %v778_v57 = vadd.f32 %v1390_v62, %v730_v31 }
 0x224   : > { %v691_v36 = vpop.f32.mrb[6].mxu0  ;;  %v733_v37 = vpop.f32.mrb[6].mxu1  ;;  %v764_v43 = vadd.f32 %v745_v32, %v689_v34 }
 0x225   : > { %v1003_v39 = vmul.f32 -1.442695, %v750_v33  ;;  %v751_v40 = vadd.f32 %v747_v29, %v691_v36  ;;  %v693_v41 = vpop.f32.mrb[7].mxu0  ;;  %v1090_v42 = vpop.f32.mrb[7].mxu1  ;;  %v779_v63 = vadd.f32 %v1390_v62, %v733_v37 }
 0x226   : > { %v765_v45 = vadd.f32 %v748_v38, %v693_v41  ;;  %v1005_v46 = vmul.f32 -1.442695, %v764_v43 }
 0x227   : > { %1190 = vpow2.f32 %v1003_v39  ;;  %v1004_v44 = vmul.f32 -1.442695, %v751_v40 }
 0x228   : > { %v1006_v47 = vmul.f32 -1.442695, %v765_v45 }
 0x229   : > { %1192 = vpow2.f32 %v1004_v44 }
 0x22a   : > { %1194 = vpow2.f32 %v1005_v46 }
 0x22b   : > { %1196 = vpow2.f32 %v1006_v47 }
 0x231   : > { %v1191_v48 = vpop.eup %1190 }
 0x232   : > { %v758_v49 = vadd.f32 1.0, %v1191_v48 }
 0x233   : > { %v1193_v50 = vpop.eup %1192 }
 0x234   : > { %1198 = vrcp.f32 %v758_v49  ;;  %v759_v51 = vadd.f32 1.0, %v1193_v50  ;;  %v1195_v52 = vpop.eup %1194 }
 0x235   : > { %v1197_v53 = vpop.eup %1196  ;;  %v772_v55 = vadd.f32 1.0, %v1195_v52 }
 0x236   : > { %1200 = vrcp.f32 %v759_v51  ;;  %v773_v58 = vadd.f32 1.0, %v1197_v53 }
 0x237   : > { %1202 = vrcp.f32 %v772_v55 }
 0x238   : > { %1204 = vrcp.f32 %v773_v58 }
 0x23e   : > { %v1199_v59 = vpop.eup %1198 }
 0x23f   : > { %v780_v60 = vmul.f32 %v1199_v59, %v778_v57 }
 0x240   : > { %v1201_v0 = vpop.eup %1200 }
 0x241   : > { %v782_v1 = vadd.f32 %v780_v60, %v746_v56  ;;  %v781_v2 = vmul.f32 %v1201_v0, %v779_v63  ;;  %v1203_v4 = vpop.eup %1202 }
 0x242   : > { %v1205_v5 = vpop.eup %1204  ;;  %v786_v6 = vsub.f32 1.0, %v1203_v4  ;;  %v790_v9 = vmul.f32 %v1203_v4, %v1401_v23 }
 0x243   : > { %1206 = vtanh.f32 %v782_v1  ;;  %v783_v3 = vadd.f32 %v781_v2, %v749_v61  ;;  %v787_v10 = vsub.f32 1.0, %v1205_v5  ;;  %v791_v13 = vmul.f32 %v1205_v5, %v1404_v24 }
 0x245   : > { %1208 = vtanh.f32 %v783_v3 }
 0x24d   : > { %v1207_v7 = vpop.eup %1206 }
 0x24e   : > { %v788_v8 = vmul.f32 %v1207_v7, %v786_v6 }
 0x24f   : > { %v1209_v11 = vpop.eup %1208 }
 0x250   : > { %v792_v62 = vadd.f32 %v790_v9, %v788_v8  ;;  %v789_v12 = vmul.f32 %v1209_v11, %v787_v10 }
 0x252   : > { %v793_v14 = vadd.f32 %v791_v13, %v789_v12 }
 0x254   : > { %v1031_v15 = vpack.c.bf16 %v793_v14, %v792_v62 }
 0x256   : > { %1032 = vst [vmem:[%s806_s30] sm:$0xff] %v1031_v15  }
 0x257 PF: > { %s13_s16 = sadd.s32 1, %s1248_s16   ;;  %s1445_s12 = smov %s1236_s13 }
 0x258   : > { %p10_p10 = scmp.ge.s32.totalorder %s13_s16, 4   ;;  %s1446_s13 = smov %s1309_s20 }
 0x259   : > { %s1447_s14 = smov %s1244_s15  ;;  %s1448_s15 = smov %s1450_s17 }
 0x25a   :  { %12 = sbr.rel (!%p10_p10) target bundleno = 3 (0x3), region = 113 }

</bundles_post_ra>
